<compile_context>
chip_gen: v5e
topology: v5e:2x2
jax: 0.10.0
libtpu: 0.0.40
codegen_flags: <defaults>
</compile_context>

<pallas_src>
import math
from functools import partial

import jax
import jax.numpy as jnp
from jax.experimental import pallas as pl
from jax.experimental.pallas import tpu as pltpu

NEG = -1e30   # "minus infinity" for masking (all sim values are >= 0)
POS = 1e30
_VMEM_LIMIT = 48 << 20   # < 64 MiB -> safe on v7x as well as v5e/v6e


def _round_up(x, m):
    return -(-x // m) * m


# ---------------------------------------------------------------------------
# Kernel 1: fused similarity (bmm) + Matcher (global max & top-4 local max)
#           grid = (B, reference-row tiles); column-max accumulated in out_ref
# ---------------------------------------------------------------------------
def _sim_matcher_kernel(qk_ref, ik_ref, pk_ref, iseg_ref, pseg_ref,
                        out_ref, qkb_ref, *, hw_q):
    # qk:   (1, C, HWq_pad)  query norm_key (f32, query axis zero-padded)
    # ik/pk:(1, C, TR)       reference norm_key tiles in native layout
    # iseg/pseg: (1, TR, 2)  seg probabilities (padded ref rows filled with NEG)
    # out:  (1, 4, HWq_pad)  rows [bg_global, fg_global, bg_local, fg_local]
    t = pl.program_id(1)

    @pl.when(t == 0)
    def _():
        # cast query key to bf16 once per batch element; init the accumulator.
        qkb_ref[...] = qk_ref[0].astype(jnp.bfloat16)
        out_ref[...] = jnp.full_like(out_ref, NEG)

    qk = qkb_ref[...]                                   # (C, HWq) bf16
    ik = ik_ref[0].astype(jnp.bfloat16)                 # (C, TR)  bf16
    pk = pk_ref[0].astype(jnp.bfloat16)

    dn = (((0,), (0,)), ((), ()))                       # contract over C (trans_a)
    init_sim = (jax.lax.dot_general(
        ik, qk, dn, preferred_element_type=jnp.float32) + 1.0) * 0.5   # (TR, HWq)
    prev_sim = (jax.lax.dot_general(
        pk, qk, dn, preferred_element_type=jnp.float32) + 1.0) * 0.5

    iseg = iseg_ref[0]                                  # (TR, 2) f32
    pseg = pseg_ref[0]

    hwq_pad = init_sim.shape[-1]
    col_valid = jax.lax.broadcasted_iota(jnp.int32, (1, hwq_pad), 1) < hw_q

    # global similarity: weight rows by init seg, max over reference rows.
    bg_g = jnp.max(init_sim * iseg[:, 0:1], axis=0, keepdims=True)
    fg_g = jnp.max(init_sim * iseg[:, 1:2], axis=0, keepdims=True)

    # local similarity: per-row top-4 cutoff computed ONCE on prev_sim
    # (scale-invariant w.r.t. the positive per-row seg weights).
    K = 4
    x = prev_sim
    xm0 = jnp.where(col_valid, x, NEG)                  # pre-mask once
    cur = xm0
    count = jnp.zeros((x.shape[0], 1), jnp.float32)
    cut = jnp.full((x.shape[0], 1), NEG, jnp.float32)
    for it in range(K):
        cur_max = jnp.max(cur, axis=1, keepdims=True)
        cur_cnt = jnp.sum(jnp.where(cur == cur_max, 1.0, 0.0),
                          axis=1, keepdims=True)
        need = count < K
        cut = jnp.where(need, cur_max, cut)
        count = count + jnp.where(need, cur_cnt, 0.0)
        if it < K - 1:
            cur = jnp.where(xm0 < cur_max, xm0, NEG)
    row_min = jnp.min(jnp.where(col_valid, x, POS), axis=1, keepdims=True)
    xm = jnp.where(x < cut, row_min, x)

    bg_l = jnp.max(xm * pseg[:, 0:1], axis=0, keepdims=True)
    fg_l = jnp.max(xm * pseg[:, 1:2], axis=0, keepdims=True)

    out_ref[0, 0:1, :] = jnp.maximum(out_ref[0, 0:1, :], bg_g)
    out_ref[0, 1:2, :] = jnp.maximum(out_ref[0, 1:2, :], fg_g)
    out_ref[0, 2:3, :] = jnp.maximum(out_ref[0, 2:3, :], bg_l)
    out_ref[0, 3:4, :] = jnp.maximum(out_ref[0, 3:4, :], fg_l)


def sim_matcher(qk, ik, pk, iseg, pseg):
    # qk/ik/pk: (B, C, HW) native layout; iseg/pseg: (B, 2, HW)
    B, C, HW = qk.shape
    HWq = _round_up(HW, 128)                    # lane-dense query / output axis
    TR = 256 if HW > 256 else _round_up(HW, 8)  # reference-row tile
    HWr = _round_up(HW, TR)
    nT = HWr // TR

    qk_p = qk if HWq == HW else jnp.pad(qk, ((0, 0), (0, 0), (0, HWq - HW)))

    def pad_key(a):
        return a if HWr == HW else jnp.pad(a, ((0, 0), (0, 0), (0, HWr - HW)))

    def seg_t(a):                               # tiny: (B, 2, HW) -> (B, HWr, 2)
        at = jnp.transpose(a, (0, 2, 1))
        if HWr != HW:                           # NEG pad rows can never win a max
            at = jnp.pad(at, ((0, 0), (0, HWr - HW), (0, 0)), constant_values=NEG)
        return at

    out = pl.pallas_call(
        partial(_sim_matcher_kernel, hw_q=HW),
        out_shape=jax.ShapeDtypeStruct((B, 4, HWq), jnp.float32),
        grid_spec=pltpu.PrefetchScalarGridSpec(
            num_scalar_prefetch=0,
            grid=(B, nT),
            in_specs=[
                pl.BlockSpec((1, C, HWq), lambda b, t: (b, 0, 0)),
                pl.BlockSpec((1, C, TR), lambda b, t: (b, 0, t)),
                pl.BlockSpec((1, C, TR), lambda b, t: (b, 0, t)),
                pl.BlockSpec((1, TR, 2), lambda b, t: (b, t, 0)),
                pl.BlockSpec((1, TR, 2), lambda b, t: (b, t, 0)),
            ],
            out_specs=pl.BlockSpec((1, 4, HWq), lambda b, t: (b, 0, 0)),
            scratch_shapes=[pltpu.VMEM((C, HWq), jnp.bfloat16)],
        ),
        compiler_params=pltpu.CompilerParams(
            dimension_semantics=("parallel", "arbitrary"),
            vmem_limit_bytes=_VMEM_LIMIT),
    )(qk_p, pad_key(ik), pad_key(pk), seg_t(iseg), seg_t(pseg))
    return out[:, :, :HW]


# ---------------------------------------------------------------------------
# Kernel 2: matmul + bias (+ optional ReLU) for the 1x1 convs.
# bf16 MXU operands (activation cast IN kernel), f32 accumulate / epilogue.
# ---------------------------------------------------------------------------
def _matmul_bias_kernel(x_ref, w_ref, b_ref, o_ref, *, relu):
    acc = jnp.dot(x_ref[...].astype(jnp.bfloat16), w_ref[...],
                  preferred_element_type=jnp.float32)
    acc = acc + b_ref[...]
    if relu:
        acc = jnp.maximum(acc, 0.0)
    o_ref[...] = acc.astype(o_ref.dtype)


def matmul_bias(x, w, bias, *, relu, out_dtype=jnp.float32):
    # x:(M,K) f32/bf16, w:(K,N) f32, bias:(N,) f32 -> (M,N) out_dtype
    M, K = x.shape
    N = w.shape[1]
    Np = _round_up(N, 128)               # lane-dense stores
    TM = M if M <= 512 else 512          # big tiles, cdiv grid (no M padding)
    gm = pl.cdiv(M, TM)
    wp = w.astype(jnp.bfloat16)
    bp = bias.reshape(1, N).astype(jnp.float32)
    if Np != N:
        wp = jnp.pad(wp, ((0, 0), (0, Np - N)))
        bp = jnp.pad(bp, ((0, 0), (0, Np - N)))
    y = pl.pallas_call(
        partial(_matmul_bias_kernel, relu=relu),
        out_shape=jax.ShapeDtypeStruct((M, Np), out_dtype),
        grid_spec=pltpu.PrefetchScalarGridSpec(
            num_scalar_prefetch=0,
            grid=(gm,),
            in_specs=[
                pl.BlockSpec((TM, K), lambda i: (i, 0)),
                pl.BlockSpec((K, Np), lambda i: (0, 0)),
                pl.BlockSpec((1, Np), lambda i: (0, 0)),
            ],
            out_specs=pl.BlockSpec((TM, Np), lambda i: (i, 0)),
        ),
        compiler_params=pltpu.CompilerParams(
            dimension_semantics=("parallel",),
            vmem_limit_bytes=_VMEM_LIMIT),
    )(x, wp, bp)
    return y if Np == N else y[:, :N]


def conv1x1(x, w_pt, bias, *, relu, out_dtype):
    # x: (B,H,W,Cin) NHWC; w_pt: (Cout,Cin,1,1) PyTorch layout
    B, H, W, Cin = x.shape
    Cout = w_pt.shape[0]
    w2 = w_pt.reshape(Cout, Cin).T
    y = matmul_bias(x.reshape(B * H * W, Cin), w2, bias, relu=relu,
                    out_dtype=out_dtype)
    return y.reshape(B, H, W, Cout)


# ---------------------------------------------------------------------------
# Kernel 3: fused 3x3 conv (+bias +ReLU) -> ConvTranspose column matmul.
# H is tiled with a manual, double-buffered halo DMA (input left in HBM).
# kh taps are leading-axis slices; kw realignment via pltpu.roll (XLU).
# ---------------------------------------------------------------------------
def _blend_deconv_kernel(x_hbm, wb_ref, bb_ref, wd_ref, cols_ref,
                         xbuf, sem, *, TH):
    b = pl.program_id(0)
    t = pl.program_id(1)
    nT = pl.num_programs(1)
    slot = t % 2

    def issue(tile, sl):
        pltpu.make_async_copy(x_hbm.at[b, pl.ds(tile * TH, TH + 2)],
                              xbuf.at[sl], sem.at[sl]).start()

    @pl.when(t == 0)
    def _():
        issue(0, 0)

    # wait for this tile's halo'd slab
    pltpu.make_async_copy(x_hbm.at[b, pl.ds(t * TH, TH + 2)],
                          xbuf.at[slot], sem.at[slot]).wait()

    # prefetch the next tile (same batch element) while computing this one
    @pl.when(t + 1 < nT)
    def _():
        issue(t + 1, 1 - slot)

    xs = xbuf[slot]                                    # (TH+2, Wp, Cin) bf16
    Wp = cols_ref.shape[2]
    Cin = xs.shape[-1]
    Cout = wb_ref.shape[-1]
    M = TH * Wp

    accs = [jnp.zeros((M, Cout), jnp.float32) for _ in range(3)]
    for kh in range(3):
        flat = xs[kh:kh + TH].reshape(M, Cin)          # leading-axis slice only
        for kw in range(3):
            accs[kw] = accs[kw] + jnp.dot(flat, wb_ref[kh * 3 + kw],
                                          preferred_element_type=jnp.float32)
    acc = (accs[0]
           + pltpu.roll(accs[1], shift=M - 1, axis=0)
           + pltpu.roll(accs[2], shift=M - 2, axis=0))
    acc = jnp.maximum(acc + bb_ref[...], 0.0)          # blend bias + ReLU (f32)

    # fused deconv column matmul: blend activation never leaves VMEM
    cols = jnp.dot(acc.astype(jnp.bfloat16), wd_ref[...],
                   preferred_element_type=jnp.float32)
    cols_ref[0] = cols.reshape(TH, Wp, cols.shape[-1]).astype(cols_ref.dtype)


def _col2im_phases(cols6, bias, *, k, s, p, out_dtype):
    # cols6: (B, Hin, Win, k, k, Cd) f32.  Assemble ConvTranspose output by
    # s*s output phases (dense adds on small grids + one interleave pass)
    # instead of k*k strided read-modify-write scatters over the full output.
    B, Hin, Win, _, _, Cd = cols6.shape
    Hout = (Hin - 1) * s - 2 * p + k
    Wout = (Win - 1) * s - 2 * p + k
    dmax = (k - 1) // s
    Hq, Wq = Hin + dmax, Win + dmax
    rows = []
    for ph in range(s):
        per_pw = []
        for pw in range(s):
            g = jnp.zeros((B, Hq, Wq, Cd), jnp.float32)
            for kh in range(ph, k, s):
                for kw in range(pw, k, s):
                    dh, dw = kh // s, kw // s
                    g = g.at[:, dh:dh + Hin, dw:dw + Win, :].add(
                        cols6[:, :, :, kh, kw, :])
            per_pw.append(g)
        rows.append(jnp.stack(per_pw, axis=0))
    canvas = jnp.stack(rows, axis=0)                    # (s, s, B, Hq, Wq, Cd)
    canvas = jnp.transpose(canvas, (2, 3, 0, 4, 1, 5))  # (B, Hq, s, Wq, s, Cd)
    canvas = canvas.reshape(B, Hq * s, Wq * s, Cd)
    out = canvas[:, p:p + Hout, p:p + Wout, :] + bias.reshape(1, 1, 1, Cd)
    return out.astype(out_dtype)


def blend_deconv(x, wb_pt, bb, wd_pt, bd, *, k, s, p, out_dtype):
    # ReLU(3x3 conv, pad 1)(x) followed by ConvTranspose2d(Cout, Cd, k, s, p).
    # x NHWC; wb_pt (Cout,Cin,3,3); wd_pt (Cout, Cd, k, k) PyTorch layouts.
    B, H, W, Cin = x.shape
    Cout = wb_pt.shape[0]
    Cd = wd_pt.shape[1]
    TH = H if H <= 8 else 8
    Hp = _round_up(H, TH)
    nT = Hp // TH
    Wp = _round_up(W + 2, 8)
    Nd = _round_up(k * k * Cd, 128)

    x_pad = jnp.pad(x.astype(jnp.bfloat16),
                    ((0, 0), (1, 1 + Hp - H), (1, Wp - W - 1), (0, 0)))
    wb = jnp.transpose(wb_pt, (2, 3, 1, 0)).reshape(9, Cin, Cout)
    wb = wb.astype(jnp.bfloat16)
    bb2 = bb.reshape(1, Cout).astype(jnp.float32)
    wd = jnp.transpose(wd_pt, (0, 2, 3, 1)).reshape(Cout, k * k * Cd)
    wd = jnp.pad(wd, ((0, 0), (0, Nd - k * k * Cd))).astype(jnp.bfloat16)

    cols = pl.pallas_call(
        partial(_blend_deconv_kernel, TH=TH),
        out_shape=jax.ShapeDtypeStruct((B, Hp, Wp, Nd), jnp.bfloat16),
        grid_spec=pltpu.PrefetchScalarGridSpec(
            num_scalar_prefetch=0,
            grid=(B, nT),
            in_specs=[
                pl.BlockSpec(memory_space=pl.ANY),              # padded image
                pl.BlockSpec((9, Cin, Cout), lambda b, t: (0, 0, 0)),
                pl.BlockSpec((1, Cout), lambda b, t: (0, 0)),
                pl.BlockSpec((Cout, Nd), lambda b, t: (0, 0)),
            ],
            out_specs=pl.BlockSpec((1, TH, Wp, Nd), lambda b, t: (b, t, 0, 0)),
            scratch_shapes=[
                pltpu.VMEM((2, TH + 2, Wp, Cin), jnp.bfloat16),
                pltpu.SemaphoreType.DMA((2,)),
            ],
        ),
        compiler_params=pltpu.CompilerParams(
            dimension_semantics=("parallel", "arbitrary"),
            vmem_limit_bytes=_VMEM_LIMIT),
    )(x_pad, wb, bb2, wd)

    cols6 = cols[:, :H, :W, :k * k * Cd].astype(jnp.float32)
    cols6 = cols6.reshape(B, H, W, k, k, Cd)
    return _col2im_phases(cols6, bd, k=k, s=s, p=p, out_dtype=out_dtype)


# ---------------------------------------------------------------------------
# Decoder / VOS forward
# ---------------------------------------------------------------------------
def decoder_forward(params, feats, sim_nhwc, mask_feats):
    # feats values are NHWC bf16; intermediates stay bf16, final output f32.
    bf16 = jnp.bfloat16
    # TODO(synk): split the channel concat into per-source K-groups inside the
    # fused blend kernel to also remove the concat HBM pass.
    w, b = params['conv1']
    u = conv1x1(feats['s16'], w, b, relu=True, out_dtype=bf16)
    u = jnp.concatenate([u, sim_nhwc.astype(bf16), mask_feats.astype(bf16)],
                        axis=-1)                                   # 256+4+256
    wb, bb = params['blend1']
    wd, bd = params['deconv1']
    out8 = blend_deconv(u, wb, bb, wd, bd, k=4, s=2, p=1, out_dtype=bf16)

    w, b = params['conv2']
    u = conv1x1(feats['s8'], w, b, relu=True, out_dtype=bf16)
    u = jnp.concatenate([u, out8], axis=-1)                        # 256+2
    wb, bb = params['blend2']
    wd, bd = params['deconv2']
    out4 = blend_deconv(u, wb, bb, wd, bd, k=4, s=2, p=1, out_dtype=bf16)

    w, b = params['conv3']
    u = conv1x1(feats['s4'], w, b, relu=True, out_dtype=bf16)
    u = jnp.concatenate([u, out4], axis=-1)                        # 256+2
    wb, bb = params['blend3']
    wd, bd = params['predictor']
    return blend_deconv(u, wb, bb, wd, bd, k=6, s=4, p=1,
                        out_dtype=jnp.float32)                     # (B,16H,16W,2)


def vos_forward(params, norm_key, feats, full_state, object_ids):
    B, C, H, W = norm_key.shape
    HW = H * W
    qk = norm_key.reshape(B, C, HW)
    feats_nhwc = {k: jnp.transpose(v, (0, 2, 3, 1)).astype(jnp.bfloat16)
                  for k, v in feats.items()}
    segscore = {}
    for oid in object_ids:
        st = full_state[oid]
        ik = st['init_norm_key'].reshape(B, C, HW)       # native layout (no HBM transpose)
        pk = st['prev_norm_key'].reshape(B, C, HW)
        iseg = st['init_seg'].reshape(B, 2, HW)
        pseg = st['prev_seg'].reshape(B, 2, HW)
        total_sim = sim_matcher(qk, ik, pk, iseg, pseg)  # (B, 4, HW) f32
        sim_nhwc = jnp.transpose(total_sim, (0, 2, 1)).reshape(B, H, W, 4)
        mask_feats_nhwc = jnp.transpose(st['mask_feats'], (0, 2, 3, 1))
        seg = decoder_forward(params, feats_nhwc, sim_nhwc, mask_feats_nhwc)
        segscore[oid] = jnp.transpose(seg, (0, 3, 1, 2))  # NCHW f32 output
    return segscore


# ---------------------------------------------------------------------------
# Deterministic parameter init (kaiming-uniform weights, zero bias)
# ---------------------------------------------------------------------------
def _kaiming(key, shape, fan_in):
    bound = math.sqrt(6.0 / fan_in)
    return jax.random.uniform(key, shape, jnp.float32, minval=-bound, maxval=bound)


def init_decoder_params(key):
    defs = {
        'conv1':     ('conv',   1024, 256, 1),
        'blend1':    ('conv',    516, 256, 3),
        'deconv1':   ('deconv',  256,   2, 4),
        'conv2':     ('conv',    512, 256, 1),
        'blend2':    ('conv',    258, 256, 3),
        'deconv2':   ('deconv',  256,   2, 4),
        'conv3':     ('conv',    256, 256, 1),
        'blend3':    ('conv',    258, 256, 3),
        'predictor': ('deconv',  256,   2, 6),
    }
    params = {}
    keys = jax.random.split(key, len(defs))
    for (name, (kind, cin, cout, k)), kk in zip(defs.items(), keys):
        if kind == 'conv':      # nn.Conv2d weight: (Cout, Cin, k, k)
            w = _kaiming(kk, (cout, cin, k, k), cin * k * k)
        else:                   # nn.ConvTranspose2d weight: (Cin, Cout, k, k)
            w = _kaiming(kk, (cin, cout, k, k), cout * k * k)
        params[name] = (w, jnp.zeros((cout,), jnp.float32))
    return params


# ---------------------------------------------------------------------------
if __name__ == "__main__":
    key = jax.random.PRNGKey(0)
    B, C, H, W = 2, 512, 4, 4     # small spatial; channel dims fixed by module
    ks = jax.random.split(key, 12)

    def l2norm(x):
        return x / jnp.linalg.norm(x, axis=1, keepdims=True)

    norm_key = l2norm(jax.random.normal(ks[0], (B, C, H, W), jnp.float32))
    init_key = l2norm(jax.random.normal(ks[1], (B, C, H, W), jnp.float32))
    prev_key = l2norm(jax.random.normal(ks[2], (B, C, H, W), jnp.float32))
    feats = {
        's16': jax.random.normal(ks[3], (B, 1024, H, W), jnp.float32),
        's8':  jax.random.normal(ks[4], (B, 512, 2 * H, 2 * W), jnp.float32),
        's4':  jax.random.normal(ks[5], (B, 256, 4 * H, 4 * W), jnp.float32),
    }
    init_seg16 = jax.nn.softmax(jax.random.normal(ks[6], (B, 2, H, W)), axis=1)
    prev_seg16 = jax.nn.softmax(jax.random.normal(ks[7], (B, 2, H, W)), axis=1)
    mask_feats = jax.random.normal(ks[8], (B, 256, H, W), jnp.float32)

    full_state = {
        1: {
            'init_norm_key': init_key,
            'prev_norm_key': prev_key,
            'init_seg': init_seg16,
            'prev_seg': prev_seg16,
            'mask_feats': mask_feats,
        }
    }
    params = init_decoder_params(ks[9])

    segscore = vos_forward(params, norm_key, feats, full_state, [1])
    for v in segscore.values():
        jax.block_until_ready(v)
    assert segscore[1].shape == (B, 2, 16 * H, 16 * W)
    assert segscore[1].dtype == jnp.float32
    print("KERNEL_OK")
</pallas_src>

<mosaic_0001>
module attributes {stable_mosaic.version = 11 : i64} {
  func.func @_sim_matcher_kernel(%arg0: i32, %arg1: i32, %arg2: memref<1x512x128xf32, #tpu.memory_space<vmem>>, %arg3: memref<1x512x16xf32, #tpu.memory_space<vmem>>, %arg4: memref<1x512x16xf32, #tpu.memory_space<vmem>>, %arg5: memref<1x16x2xf32, #tpu.memory_space<vmem>>, %arg6: memref<1x16x2xf32, #tpu.memory_space<vmem>>, %arg7: memref<1x4x128xf32, #tpu.memory_space<vmem>>, %arg8: memref<512x128xbf16, #tpu.memory_space<vmem>>) attributes {dimension_semantics = [#tpu.dimension_semantics<parallel>, #tpu.dimension_semantics<arbitrary>], iteration_bounds = array<i64: 2, 1>, scalar_prefetch = 0 : i64, scratch_operands = 1 : i64, tpu.core_type = #tpu.core_type<tc>, window_params = [{transform_indices = @transform_0, window_bounds = array<i64: 1, 512, 128>}, {transform_indices = @transform_1, window_bounds = array<i64: 1, 512, 16>}, {transform_indices = @transform_2, window_bounds = array<i64: 1, 512, 16>}, {transform_indices = @transform_3, window_bounds = array<i64: 1, 16, 2>}, {transform_indices = @transform_4, window_bounds = array<i64: 1, 16, 2>}, {transform_indices = @transform_5, window_bounds = array<i64: 1, 4, 128>}]} {
    %c0_i32 = arith.constant 0 : i32
    %0 = arith.cmpi eq, %arg1, %c0_i32 : i32
    %1 = arith.extui %0 : i1 to i32
    %c0_i32_0 = arith.constant 0 : i32
    %2 = arith.cmpi ne, %1, %c0_i32_0 : i32
    scf.if %2 {
      %c0_72 = arith.constant 0 : index
      %c0_73 = arith.constant 0 : index
      %c0_74 = arith.constant 0 : index
      %150 = vector.load %arg2[%c0_72, %c0_73, %c0_74] : memref<1x512x128xf32, #tpu.memory_space<vmem>>, vector<1x512x128xf32>
      %151 = vector.shape_cast %150 : vector<1x512x128xf32> to vector<512x128xf32>
      %152 = arith.truncf %151 : vector<512x128xf32> to vector<512x128xbf16>
      %c0_75 = arith.constant 0 : index
      %c0_76 = arith.constant 0 : index
      %153 = vector.load %arg8[%c0_75, %c0_76] : memref<512x128xbf16, #tpu.memory_space<vmem>>, vector<512x128xbf16>
      tpu.vector_store %arg8[%c0_75, %c0_76], %152 {strides = array<i32>} : memref<512x128xbf16, #tpu.memory_space<vmem>>, vector<512x128xbf16>,
      %cst_77 = arith.constant -1.000000e+30 : f32
      %154 = vector.broadcast %cst_77 : f32 to vector<1x4x128xf32>
      %c0_78 = arith.constant 0 : index
      %c0_79 = arith.constant 0 : index
      %c0_80 = arith.constant 0 : index
      %155 = vector.load %arg7[%c0_78, %c0_79, %c0_80] : memref<1x4x128xf32, #tpu.memory_space<vmem>>, vector<1x4x128xf32>
      tpu.vector_store %arg7[%c0_78, %c0_79, %c0_80], %154 {strides = array<i32>} : memref<1x4x128xf32, #tpu.memory_space<vmem>>, vector<1x4x128xf32>,
    } else {
    }
    %c0 = arith.constant 0 : index
    %c0_1 = arith.constant 0 : index
    %3 = vector.load %arg8[%c0, %c0_1] : memref<512x128xbf16, #tpu.memory_space<vmem>>, vector<512x128xbf16>
    %c0_2 = arith.constant 0 : index
    %c0_3 = arith.constant 0 : index
    %c0_4 = arith.constant 0 : index
    %4 = vector.load %arg3[%c0_2, %c0_3, %c0_4] : memref<1x512x16xf32, #tpu.memory_space<vmem>>, vector<1x512x16xf32>
    %5 = vector.shape_cast %4 : vector<1x512x16xf32> to vector<512x16xf32>
    %6 = arith.truncf %5 : vector<512x16xf32> to vector<512x16xbf16>
    %c0_5 = arith.constant 0 : index
    %c0_6 = arith.constant 0 : index
    %c0_7 = arith.constant 0 : index
    %7 = vector.load %arg4[%c0_5, %c0_6, %c0_7] : memref<1x512x16xf32, #tpu.memory_space<vmem>>, vector<1x512x16xf32>
    %8 = vector.shape_cast %7 : vector<1x512x16xf32> to vector<512x16xf32>
    %9 = arith.truncf %8 : vector<512x16xf32> to vector<512x16xbf16>
    %cst = arith.constant dense<0.000000e+00> : vector<16x128xf32>
    %10 = tpu.matmul %6, %3, %cst {dimension_numbers = #tpu.dot_dimension_numbers<[0], [0], [1], [1], [0, 1, 1, 1], [], []>} : vector<512x16xbf16>, vector<512x128xbf16>, vector<16x128xf32> -> vector<16x128xf32>
    %cst_8 = arith.constant 1.000000e+00 : f32
    %11 = vector.broadcast %cst_8 : f32 to vector<16x128xf32>
    %12 = arith.addf %10, %11 : vector<16x128xf32>
    %cst_9 = arith.constant 5.000000e-01 : f32
    %13 = vector.broadcast %cst_9 : f32 to vector<16x128xf32>
    %14 = arith.mulf %12, %13 : vector<16x128xf32>
    %cst_10 = arith.constant dense<0.000000e+00> : vector<16x128xf32>
    %15 = tpu.matmul %9, %3, %cst_10 {dimension_numbers = #tpu.dot_dimension_numbers<[0], [0], [1], [1], [0, 1, 1, 1], [], []>} : vector<512x16xbf16>, vector<512x128xbf16>, vector<16x128xf32> -> vector<16x128xf32>
    %cst_11 = arith.constant 1.000000e+00 : f32
    %16 = vector.broadcast %cst_11 : f32 to vector<16x128xf32>
    %17 = arith.addf %15, %16 : vector<16x128xf32>
    %cst_12 = arith.constant 5.000000e-01 : f32
    %18 = vector.broadcast %cst_12 : f32 to vector<16x128xf32>
    %19 = arith.mulf %17, %18 : vector<16x128xf32>
    %c0_13 = arith.constant 0 : index
    %c0_14 = arith.constant 0 : index
    %c0_15 = arith.constant 0 : index
    %20 = vector.load %arg5[%c0_13, %c0_14, %c0_15] : memref<1x16x2xf32, #tpu.memory_space<vmem>>, vector<1x16x2xf32>
    %21 = vector.shape_cast %20 : vector<1x16x2xf32> to vector<16x2xf32>
    %c0_16 = arith.constant 0 : index
    %c0_17 = arith.constant 0 : index
    %c0_18 = arith.constant 0 : index
    %22 = vector.load %arg6[%c0_16, %c0_17, %c0_18] : memref<1x16x2xf32, #tpu.memory_space<vmem>>, vector<1x16x2xf32>
    %23 = vector.shape_cast %22 : vector<1x16x2xf32> to vector<16x2xf32>
    %24 = tpu.iota {dimensions = array<i32: 1>} : vector<1x128xi32>
    %c16_i32 = arith.constant 16 : i32
    %25 = vector.broadcast %c16_i32 : i32 to vector<1x128xi32>
    %26 = arith.cmpi slt, %24, %25 : vector<1x128xi32>
    %27 = vector.extract_strided_slice %21 {offsets = [0, 0], sizes = [16, 1], strides = [1, 1]} : vector<16x2xf32> to vector<16x1xf32>
    %28 = vector.broadcast %27 : vector<16x1xf32> to vector<16x128xf32>
    %29 = arith.mulf %14, %28 : vector<16x128xf32>
    %cst_19 = arith.constant dense<0xFF800000> : vector<128xf32>
    %30 = vector.multi_reduction <maximumf>, %29, %cst_19 [0] : vector<16x128xf32> to vector<128xf32>
    %31 = vector.shape_cast %30 : vector<128xf32> to vector<1x128xf32>
    %32 = vector.extract_strided_slice %21 {offsets = [0, 1], sizes = [16, 1], strides = [1, 1]} : vector<16x2xf32> to vector<16x1xf32>
    %33 = vector.broadcast %32 : vector<16x1xf32> to vector<16x128xf32>
    %34 = arith.mulf %14, %33 : vector<16x128xf32>
    %cst_20 = arith.constant dense<0xFF800000> : vector<128xf32>
    %35 = vector.multi_reduction <maximumf>, %34, %cst_20 [0] : vector<16x128xf32> to vector<128xf32>
    %36 = vector.shape_cast %35 : vector<128xf32> to vector<1x128xf32>
    %cst_21 = arith.constant -1.000000e+30 : f32
    %37 = vector.shape_cast %26 : vector<1x128xi1> to vector<1x128xi1>
    %38 = vector.broadcast %37 : vector<1x128xi1> to vector<16x128xi1>
    %39 = vector.broadcast %cst_21 : f32 to vector<16x128xf32>
    %40 = arith.select %38, %19, %39 : vector<16x128xi1>, vector<16x128xf32>
    %cst_22 = arith.constant 0.000000e+00 : f32
    %41 = vector.broadcast %cst_22 : f32 to vector<16x1xf32>
    %cst_23 = arith.constant -1.000000e+30 : f32
    %42 = vector.broadcast %cst_23 : f32 to vector<16x1xf32>
    %cst_24 = arith.constant dense<0xFF800000> : vector<16xf32>
    %43 = vector.multi_reduction <maximumf>, %40, %cst_24 [1] : vector<16x128xf32> to vector<16xf32>
    %44 = vector.shape_cast %43 : vector<16xf32> to vector<16x1xf32>
    %45 = vector.broadcast %44 : vector<16x1xf32> to vector<16x128xf32>
    %46 = arith.cmpf oeq, %40, %45 : vector<16x128xf32>
    %cst_25 = arith.constant 1.000000e+00 : f32
    %cst_26 = arith.constant 0.000000e+00 : f32
    %47 = vector.broadcast %cst_25 : f32 to vector<16x128xf32>
    %48 = vector.broadcast %cst_26 : f32 to vector<16x128xf32>
    %49 = arith.select %46, %47, %48 : vector<16x128xi1>, vector<16x128xf32>
    %cst_27 = arith.constant dense<0.000000e+00> : vector<16xf32>
    %50 = vector.multi_reduction <add>, %49, %cst_27 [1] : vector<16x128xf32> to vector<16xf32>
    %51 = vector.shape_cast %50 : vector<16xf32> to vector<16x1xf32>
    %cst_28 = arith.constant 4.000000e+00 : f32
    %52 = vector.broadcast %cst_28 : f32 to vector<16x1xf32>
    %53 = arith.cmpf olt, %41, %52 : vector<16x1xf32>
    %54 = arith.select %53, %44, %42 : vector<16x1xi1>, vector<16x1xf32>
    %cst_29 = arith.constant 0.000000e+00 : f32
    %55 = vector.broadcast %cst_29 : f32 to vector<16x1xf32>
    %56 = arith.select %53, %51, %55 : vector<16x1xi1>, vector<16x1xf32>
    %57 = arith.addf %41, %56 : vector<16x1xf32>
    %58 = vector.broadcast %44 : vector<16x1xf32> to vector<16x128xf32>
    %59 = arith.cmpf olt, %40, %58 : vector<16x128xf32>
    %cst_30 = arith.constant -1.000000e+30 : f32
    %60 = vector.broadcast %cst_30 : f32 to vector<16x128xf32>
    %61 = arith.select %59, %40, %60 : vector<16x128xi1>, vector<16x128xf32>
    %cst_31 = arith.constant dense<0xFF800000> : vector<16xf32>
    %62 = vector.multi_reduction <maximumf>, %61, %cst_31 [1] : vector<16x128xf32> to vector<16xf32>
    %63 = vector.shape_cast %62 : vector<16xf32> to vector<16x1xf32>
    %64 = vector.broadcast %63 : vector<16x1xf32> to vector<16x128xf32>
    %65 = arith.cmpf oeq, %61, %64 : vector<16x128xf32>
    %cst_32 = arith.constant 1.000000e+00 : f32
    %cst_33 = arith.constant 0.000000e+00 : f32
    %66 = vector.broadcast %cst_32 : f32 to vector<16x128xf32>
    %67 = vector.broadcast %cst_33 : f32 to vector<16x128xf32>
    %68 = arith.select %65, %66, %67 : vector<16x128xi1>, vector<16x128xf32>
    %cst_34 = arith.constant dense<0.000000e+00> : vector<16xf32>
    %69 = vector.multi_reduction <add>, %68, %cst_34 [1] : vector<16x128xf32> to vector<16xf32>
    %70 = vector.shape_cast %69 : vector<16xf32> to vector<16x1xf32>
    %cst_35 = arith.constant 4.000000e+00 : f32
    %71 = vector.broadcast %cst_35 : f32 to vector<16x1xf32>
    %72 = arith.cmpf olt, %57, %71 : vector<16x1xf32>
    %73 = arith.select %72, %63, %54 : vector<16x1xi1>, vector<16x1xf32>
    %cst_36 = arith.constant 0.000000e+00 : f32
    %74 = vector.broadcast %cst_36 : f32 to vector<16x1xf32>
    %75 = arith.select %72, %70, %74 : vector<16x1xi1>, vector<16x1xf32>
    %76 = arith.addf %57, %75 : vector<16x1xf32>
    %77 = vector.broadcast %63 : vector<16x1xf32> to vector<16x128xf32>
    %78 = arith.cmpf olt, %40, %77 : vector<16x128xf32>
    %cst_37 = arith.constant -1.000000e+30 : f32
    %79 = vector.broadcast %cst_37 : f32 to vector<16x128xf32>
    %80 = arith.select %78, %40, %79 : vector<16x128xi1>, vector<16x128xf32>
    %cst_38 = arith.constant dense<0xFF800000> : vector<16xf32>
    %81 = vector.multi_reduction <maximumf>, %80, %cst_38 [1] : vector<16x128xf32> to vector<16xf32>
    %82 = vector.shape_cast %81 : vector<16xf32> to vector<16x1xf32>
    %83 = vector.broadcast %82 : vector<16x1xf32> to vector<16x128xf32>
    %84 = arith.cmpf oeq, %80, %83 : vector<16x128xf32>
    %cst_39 = arith.constant 1.000000e+00 : f32
    %cst_40 = arith.constant 0.000000e+00 : f32
    %85 = vector.broadcast %cst_39 : f32 to vector<16x128xf32>
    %86 = vector.broadcast %cst_40 : f32 to vector<16x128xf32>
    %87 = arith.select %84, %85, %86 : vector<16x128xi1>, vector<16x128xf32>
    %cst_41 = arith.constant dense<0.000000e+00> : vector<16xf32>
    %88 = vector.multi_reduction <add>, %87, %cst_41 [1] : vector<16x128xf32> to vector<16xf32>
    %89 = vector.shape_cast %88 : vector<16xf32> to vector<16x1xf32>
    %cst_42 = arith.constant 4.000000e+00 : f32
    %90 = vector.broadcast %cst_42 : f32 to vector<16x1xf32>
    %91 = arith.cmpf olt, %76, %90 : vector<16x1xf32>
    %92 = arith.select %91, %82, %73 : vector<16x1xi1>, vector<16x1xf32>
    %cst_43 = arith.constant 0.000000e+00 : f32
    %93 = vector.broadcast %cst_43 : f32 to vector<16x1xf32>
    %94 = arith.select %91, %89, %93 : vector<16x1xi1>, vector<16x1xf32>
    %95 = arith.addf %76, %94 : vector<16x1xf32>
    %96 = vector.broadcast %82 : vector<16x1xf32> to vector<16x128xf32>
    %97 = arith.cmpf olt, %40, %96 : vector<16x128xf32>
    %cst_44 = arith.constant -1.000000e+30 : f32
    %98 = vector.broadcast %cst_44 : f32 to vector<16x128xf32>
    %99 = arith.select %97, %40, %98 : vector<16x128xi1>, vector<16x128xf32>
    %cst_45 = arith.constant dense<0xFF800000> : vector<16xf32>
    %100 = vector.multi_reduction <maximumf>, %99, %cst_45 [1] : vector<16x128xf32> to vector<16xf32>
    %101 = vector.shape_cast %100 : vector<16xf32> to vector<16x1xf32>
    %cst_46 = arith.constant 4.000000e+00 : f32
    %102 = vector.broadcast %cst_46 : f32 to vector<16x1xf32>
    %103 = arith.cmpf olt, %95, %102 : vector<16x1xf32>
    %104 = arith.select %103, %101, %92 : vector<16x1xi1>, vector<16x1xf32>
    %cst_47 = arith.constant 1.000000e+30 : f32
    %105 = vector.shape_cast %26 : vector<1x128xi1> to vector<1x128xi1>
    %106 = vector.broadcast %105 : vector<1x128xi1> to vector<16x128xi1>
    %107 = vector.broadcast %cst_47 : f32 to vector<16x128xf32>
    %108 = arith.select %106, %19, %107 : vector<16x128xi1>, vector<16x128xf32>
    %cst_48 = arith.constant dense<0x7F800000> : vector<16xf32>
    %109 = vector.multi_reduction <minimumf>, %108, %cst_48 [1] : vector<16x128xf32> to vector<16xf32>
    %110 = vector.shape_cast %109 : vector<16xf32> to vector<16x1xf32>
    %111 = vector.broadcast %104 : vector<16x1xf32> to vector<16x128xf32>
    %112 = arith.cmpf olt, %19, %111 : vector<16x128xf32>
    %113 = vector.shape_cast %110 : vector<16x1xf32> to vector<16x1xf32>
    %114 = vector.broadcast %113 : vector<16x1xf32> to vector<16x128xf32>
    %115 = arith.select %112, %114, %19 : vector<16x128xi1>, vector<16x128xf32>
    %116 = vector.extract_strided_slice %23 {offsets = [0, 0], sizes = [16, 1], strides = [1, 1]} : vector<16x2xf32> to vector<16x1xf32>
    %117 = vector.broadcast %116 : vector<16x1xf32> to vector<16x128xf32>
    %118 = arith.mulf %115, %117 : vector<16x128xf32>
    %cst_49 = arith.constant dense<0xFF800000> : vector<128xf32>
    %119 = vector.multi_reduction <maximumf>, %118, %cst_49 [0] : vector<16x128xf32> to vector<128xf32>
    %120 = vector.shape_cast %119 : vector<128xf32> to vector<1x128xf32>
    %121 = vector.extract_strided_slice %23 {offsets = [0, 1], sizes = [16, 1], strides = [1, 1]} : vector<16x2xf32> to vector<16x1xf32>
    %122 = vector.broadcast %121 : vector<16x1xf32> to vector<16x128xf32>
    %123 = arith.mulf %115, %122 : vector<16x128xf32>
    %cst_50 = arith.constant dense<0xFF800000> : vector<128xf32>
    %124 = vector.multi_reduction <maximumf>, %123, %cst_50 [0] : vector<16x128xf32> to vector<128xf32>
    %125 = vector.shape_cast %124 : vector<128xf32> to vector<1x128xf32>
    %c0_51 = arith.constant 0 : index
    %c0_52 = arith.constant 0 : index
    %c0_53 = arith.constant 0 : index
    %126 = vector.load %arg7[%c0_51, %c0_52, %c0_53] : memref<1x4x128xf32, #tpu.memory_space<vmem>>, vector<1x1x128xf32>
    %127 = vector.shape_cast %126 : vector<1x1x128xf32> to vector<1x128xf32>
    %128 = arith.maximumf %127, %31 : vector<1x128xf32>
    %c0_54 = arith.constant 0 : index
    %c0_55 = arith.constant 0 : index
    %c0_56 = arith.constant 0 : index
    %129 = vector.load %arg7[%c0_54, %c0_55, %c0_56] : memref<1x4x128xf32, #tpu.memory_space<vmem>>, vector<1x1x128xf32>
    %130 = vector.shape_cast %129 : vector<1x1x128xf32> to vector<1x128xf32>
    %131 = vector.shape_cast %128 : vector<1x128xf32> to vector<1x1x128xf32>
    tpu.vector_store %arg7[%c0_54, %c0_55, %c0_56], %131 {strides = array<i32>} : memref<1x4x128xf32, #tpu.memory_space<vmem>>, vector<1x1x128xf32>,
    %c0_57 = arith.constant 0 : index
    %c1 = arith.constant 1 : index
    %c0_58 = arith.constant 0 : index
    %132 = vector.load %arg7[%c0_57, %c1, %c0_58] : memref<1x4x128xf32, #tpu.memory_space<vmem>>, vector<1x1x128xf32>
    %133 = vector.shape_cast %132 : vector<1x1x128xf32> to vector<1x128xf32>
    %134 = arith.maximumf %133, %36 : vector<1x128xf32>
    %c0_59 = arith.constant 0 : index
    %c1_60 = arith.constant 1 : index
    %c0_61 = arith.constant 0 : index
    %135 = vector.load %arg7[%c0_59, %c1_60, %c0_61] : memref<1x4x128xf32, #tpu.memory_space<vmem>>, vector<1x1x128xf32>
    %136 = vector.shape_cast %135 : vector<1x1x128xf32> to vector<1x128xf32>
    %137 = vector.shape_cast %134 : vector<1x128xf32> to vector<1x1x128xf32>
    tpu.vector_store %arg7[%c0_59, %c1_60, %c0_61], %137 {strides = array<i32>} : memref<1x4x128xf32, #tpu.memory_space<vmem>>, vector<1x1x128xf32>,
    %c0_62 = arith.constant 0 : index
    %c2 = arith.constant 2 : index
    %c0_63 = arith.constant 0 : index
    %138 = vector.load %arg7[%c0_62, %c2, %c0_63] : memref<1x4x128xf32, #tpu.memory_space<vmem>>, vector<1x1x128xf32>
    %139 = vector.shape_cast %138 : vector<1x1x128xf32> to vector<1x128xf32>
    %140 = arith.maximumf %139, %120 : vector<1x128xf32>
    %c0_64 = arith.constant 0 : index
    %c2_65 = arith.constant 2 : index
    %c0_66 = arith.constant 0 : index
    %141 = vector.load %arg7[%c0_64, %c2_65, %c0_66] : memref<1x4x128xf32, #tpu.memory_space<vmem>>, vector<1x1x128xf32>
    %142 = vector.shape_cast %141 : vector<1x1x128xf32> to vector<1x128xf32>
    %143 = vector.shape_cast %140 : vector<1x128xf32> to vector<1x1x128xf32>
    tpu.vector_store %arg7[%c0_64, %c2_65, %c0_66], %143 {strides = array<i32>} : memref<1x4x128xf32, #tpu.memory_space<vmem>>, vector<1x1x128xf32>,
    %c0_67 = arith.constant 0 : index
    %c3 = arith.constant 3 : index
    %c0_68 = arith.constant 0 : index
    %144 = vector.load %arg7[%c0_67, %c3, %c0_68] : memref<1x4x128xf32, #tpu.memory_space<vmem>>, vector<1x1x128xf32>
    %145 = vector.shape_cast %144 : vector<1x1x128xf32> to vector<1x128xf32>
    %146 = arith.maximumf %145, %125 : vector<1x128xf32>
    %c0_69 = arith.constant 0 : index
    %c3_70 = arith.constant 3 : index
    %c0_71 = arith.constant 0 : index
    %147 = vector.load %arg7[%c0_69, %c3_70, %c0_71] : memref<1x4x128xf32, #tpu.memory_space<vmem>>, vector<1x1x128xf32>
    %148 = vector.shape_cast %147 : vector<1x1x128xf32> to vector<1x128xf32>
    %149 = vector.shape_cast %146 : vector<1x128xf32> to vector<1x1x128xf32>
    tpu.vector_store %arg7[%c0_69, %c3_70, %c0_71], %149 {strides = array<i32>} : memref<1x4x128xf32, #tpu.memory_space<vmem>>, vector<1x1x128xf32>,
    return
  }
  func.func @transform_0(%arg0: i32, %arg1: i32) -> (i32, i32, i32) {
    %c0_i32 = arith.constant 0 : i32
    %c0_i32_0 = arith.constant 0 : i32
    %c0_i32_1 = arith.constant 0 : i32
    return %arg0, %c0_i32, %c0_i32_0 : i32, i32, i32
  }
  func.func @transform_1(%arg0: i32, %arg1: i32) -> (i32, i32, i32) {
    %c0_i32 = arith.constant 0 : i32
    %c0_i32_0 = arith.constant 0 : i32
    return %arg0, %c0_i32, %arg1 : i32, i32, i32
  }
  func.func @transform_2(%arg0: i32, %arg1: i32) -> (i32, i32, i32) {
    %c0_i32 = arith.constant 0 : i32
    %c0_i32_0 = arith.constant 0 : i32
    return %arg0, %c0_i32, %arg1 : i32, i32, i32
  }
  func.func @transform_3(%arg0: i32, %arg1: i32) -> (i32, i32, i32) {
    %c0_i32 = arith.constant 0 : i32
    %c0_i32_0 = arith.constant 0 : i32
    return %arg0, %arg1, %c0_i32 : i32, i32, i32
  }
  func.func @transform_4(%arg0: i32, %arg1: i32) -> (i32, i32, i32) {
    %c0_i32 = arith.constant 0 : i32
    %c0_i32_0 = arith.constant 0 : i32
    return %arg0, %arg1, %c0_i32 : i32, i32, i32
  }
  func.func @transform_5(%arg0: i32, %arg1: i32) -> (i32, i32, i32) {
    %c0_i32 = arith.constant 0 : i32
    %c0_i32_0 = arith.constant 0 : i32
    %c0_i32_1 = arith.constant 0 : i32
    return %arg0, %c0_i32, %c0_i32_0 : i32, i32, i32
  }
}

</mosaic_0001>

<bundles_post_ra>
// kernel: tpu_custom_call.1
= control target key start
LH: loop header
LB: loop body
LE: loop exit
PB: predicated region body
PF: predicated region fallthrough
CT: control target
= control target key end

     0   :  { %10 = vsyncpa [#allocation4], 0  ;;  %s2814_s0 = inlined_call_operand.vmem [shape: f32[2,512,128], index: 0, kind: input, shape index: {}]   ;;  %s2815_s1 = inlined_call_operand.vmem [shape: f32[2,512,16], index: 1, kind: input, shape index: {}]   ;;  %s2816_s2 = inlined_call_operand.vmem [shape: f32[2,512,16], index: 2, kind: input, shape index: {}]   ;;  %s2817_s3 = inlined_call_operand.vmem [shape: f32[2,16,2], index: 3, kind: input, shape index: {}]   ;;  %s2818_s4 = inlined_call_operand.vmem [shape: f32[2,16,2], index: 4, kind: input, shape index: {}]   ;;  %s2819_s5 = inlined_call_operand.hbm [shape: f32[2,4,128], index: 5, kind: output, shape index: {}]  }
   0x1   :  { %12 = vsyncpa [#allocation4 + $0x1], 0  ;;  %s2244_s18 = smov 0   ;;  %s2246_s19 = smov 0  }
   0x2   :  { %s2248_s20 = smov 0   ;;  %s2250_s21 = smov 0  }
   0x3   :  { %s2252_s22 = smov 0   ;;  %s2254_s23 = smov 0  }
   0x4 LB: > { %s1597_s24 = sadd.s32 4294967295, %s2204_s23   ;;  %s1598_s25 = sadd.s32 4294967294, %s2204_s23   ;;  %s2204_s23 = sphi %s2254_s23, %s18_s23   ;;  %s2200_s22 = sphi %s2252_s22, %s2826_s22   ;;  %s2196_s21 = sphi %s2250_s21, %s2825_s21   ;;  %s2192_s20 = sphi %s2248_s20, %s2824_s20   ;;  %s2188_s19 = sphi %s2246_s19, %s2823_s19   ;;  %s2184_s18 = sphi %s2244_s18, %s2822_s18  }
   0x5   : > { %s30_s26 = sadd.s32 1, %s2200_s22  ;;  %s175_s27 = sadd.s32 1, %s2192_s20 }
   0x6   : > { %p32_p0 = scmp.ge.s32.totalorder %s30_s26, 2  ;;  %p185_p1 = scmp.ne.s32.totalorder %s2192_s20, %s2188_s19 }
   0x7   : > { %p186_p2 = scmp.eq.s32.totalorder %s1597_s24, 1  ;;  %p191_p3 = scmp.ne.s32.totalorder %s2188_s19, %s2184_s18 }
   0x8   : > { %s2828_s26 = smov (%p32_p0, %s30_s26), 0  ;;  %p192_p5 = scmp.eq.s32.totalorder %s1598_s25, 1 }
   0x9   : > { %p2284_p4 = por %p186_p2, %p185_p1  ;;  %s172_s29 = ssub.s32 %s2200_s22, %s2828_s26 }
   0xa   : > { %p1601_p6 = scmp.ge.s32.totalorder %s2204_s23, 1  ;;  %p173_p7 = scmp.eq.s32.totalorder %s172_s29, 0 }
   0xb   : > { %p2291_p8 = por %p192_p5, %p191_p3  ;;  %p266_p9 = scmp.lt.s32.totalorder %s2204_s23, 3 }
   0xc   : > { %s2297_s6 = scalar_select %p173_p7, %s2192_s20, %s175_s27  }
   0xd   : > { %p267_p10 = pnand %p1601_p6, %p266_p9 }
   0xe   : > { %p328_p11 = scmp.lt.s32.totalorder (!%p267_p10), %s2196_s21, 1 }
   0xf   : > { %270 = sbr.rel (%p267_p10) target bundleno = 952 (0x3b8), region = 40 }
  0x14   : > { %s2301_s7 = scalar_select %p328_p11, %s2196_s21, 1 }
  0x16   : > { %s2304_s8 = sshll.u32 %s2301_s7, 9  ;;  %s1748_s24 = sshll.u32 %s2301_s7, 4 }
  0x17   : > { %s2310_s11 = scalar_lea.vmem %s2815_s1, %s2304_s8  ;;  %s2364_s14 = scalar_lea.vmem %s2814_s0, %s2304_s8 }
  0x18   : > { %v646_v0 = vld [vmem:[%s2310_s11 + $0x80] sm:$0xff]  ;;  %v647_v1 = vld [vmem:[%s2310_s11 + $0x88] sm:$0xff]  ;;  %v648_v12 = vld [vmem:[%s2310_s11 + $0x90] sm:$0xff]  ;;  %s2370_s17 = scalar_lea.vmem %s2816_s2, %s2304_s8  ;;  %s357_s29 = scalar_lea.vmem %s2817_s3, %s1748_s24 }
  0x19   : > { %v678_v2 = vld [vmem:[%s2310_s11 + $0x180] sm:$0xff]  ;;  %v679_v3 = vld [vmem:[%s2310_s11 + $0x188] sm:$0xff]  ;;  %v702_v4 = vpack.c.bf16 %v647_v1, %v646_v0  ;;  %v649_v13 = vld [vmem:[%s2310_s11 + $0x98] sm:$0xff]  ;;  %s325_s8 = sand.u32 1, %s2188_s19   ;;  %s2736_s13 = scalar_lea.vmem %s2818_s4, %s1748_s24 }
  0x1a   : > { %v630_v5 = vld [vmem:[%s2310_s11] sm:$0xff]  ;;  %v631_v6 = vld [vmem:[%s2310_s11 + $0x8] sm:$0xff]  ;;  %v718_v7 = vpack.c.bf16 %v679_v3, %v678_v2  ;;  %v680_v14 = vld [vmem:[%s2310_s11 + $0x190] sm:$0xff]  ;;  %v703_v20 = vpack.c.bf16 %v649_v13, %v648_v12  ;;  %s1602_s9 = sshll.u32 %s325_s8, 2  ;;  %s1742_s7 = sshll.u32 %s2196_s21, 2 }
  0x1b   : > { %v662_v8 = vld [vmem:[%s2310_s11 + $0x100] sm:$0xff]  ;;  %v663_v9 = vld [vmem:[%s2310_s11 + $0x108] sm:$0xff]  ;;  %v694_v10 = vpack.c.bf16 %v631_v6, %v630_v5  ;;  %v681_v15 = vld [vmem:[%s2310_s11 + $0x198] sm:$0xff]  ;;  %s2684_s10 = scalar_lea.vmem [#allocation3], %s1602_s9  ;;  %s1453_s16 = scalar_lea.hbm %s2819_s5, %s1742_s7 }
  0x1c   : > { %v710_v11 = vpack.c.bf16 %v663_v9, %v662_v8  ;;  %2110 = vxpose.binary.xlu1.c.b16.start [1/16] (narrow) %v702_v4, %v718_v7, 16  ;;  %v632_v16 = vld [vmem:[%s2310_s11 + $0x10] sm:$0xff]  ;;  %v633_v17 = vld [vmem:[%s2310_s11 + $0x18] sm:$0xff]  ;;  %v719_v21 = vpack.c.bf16 %v681_v15, %v680_v14  ;;  %v650_v24 = vld [vmem:[%s2310_s11 + $0xa0] sm:$0xff]  ;;  %s1457_s24 = sshll.u32 %s1453_s16, 4  ;;  %s1443_s21 = scalar_lea.sflag [#allocation4], %s325_s8  ;;  %s1458_s24 = int_to_ptr.hbm [resolvable:$true] %s1457_s24 }
  0x1d   : > { %v664_v18 = vld [vmem:[%s2310_s11 + $0x110] sm:$0xff]  ;;  %v665_v19 = vld [vmem:[%s2310_s11 + $0x118] sm:$0xff]  ;;  %v695_v22 = vpack.c.bf16 %v633_v17, %v632_v16  ;;  %v651_v25 = vld [vmem:[%s2310_s11 + $0xa8] sm:$0xff]  ;;  %s2140_s25 = sshra.s32 %s1458_s24, 4  ;;  %s2141_s25 = int_to_ptr.hbm [resolvable:$true] %s2140_s25 }
  0x1e   : > { %2100 = vxpose.binary.xlu0.c.b16.start [1/16] (narrow) %v694_v10, %v710_v11, 16  ;;  %v711_v23 = vpack.c.bf16 %v665_v19, %v664_v18  ;;  %v682_v26 = vld [vmem:[%s2310_s11 + $0x1a0] sm:$0xff]  ;;  %v683_v27 = vld [vmem:[%s2310_s11 + $0x1a8] sm:$0xff]  ;;  %v704_v32 = vpack.c.bf16 %v651_v25, %v650_v24  ;;  %v652_v36 = vld [vmem:[%s2310_s11 + $0xb0] sm:$0xff]  ;;  %s2142_s27 = scalar_lea.hbm %s2141_s25, 4  ;;  %p2147_p1 = scmp.lt.s32.totalorder %s2141_s25, %s2819_s5 }
  0x1f   : > { %v634_v28 = vld [vmem:[%s2310_s11 + $0x20] sm:$0xff]  ;;  %v635_v29 = vld [vmem:[%s2310_s11 + $0x28] sm:$0xff]  ;;  %v720_v33 = vpack.c.bf16 %v683_v27, %v682_v26  ;;  %v653_v37 = vld [vmem:[%s2310_s11 + $0xb8] sm:$0xff]  ;;  %p2143_p12 = scmp.ne.s32.totalorder %s2141_s25, %s2142_s27 }
  0x20   : > { %v666_v30 = vld [vmem:[%s2310_s11 + $0x120] sm:$0xff]  ;;  %v667_v31 = vld [vmem:[%s2310_s11 + $0x128] sm:$0xff]  ;;  %v696_v34 = vpack.c.bf16 %v635_v29, %v634_v28  ;;  %v684_v38 = vld [vmem:[%s2310_s11 + $0x1b0] sm:$0xff]  ;;  %v705_v44 = vpack.c.bf16 %v653_v37, %v652_v36 }
  0x21   : > { %v712_v35 = vpack.c.bf16 %v667_v31, %v666_v30  ;;  %v685_v39 = vld [vmem:[%s2310_s11 + $0x1b8] sm:$0xff]  ;;  %v636_v40 = vld [vmem:[%s2310_s11 + $0x30] sm:$0xff]  ;;  %v654_v48 = vld [vmem:[%s2310_s11 + $0xc0] sm:$0xff]  ;;  %p2144_p13 = pnand %p2143_p12, %p2284_p4 }
  0x22   : > { %v637_v41 = vld [vmem:[%s2310_s11 + $0x38] sm:$0xff]  ;;  %v668_v42 = vld [vmem:[%s2310_s11 + $0x130] sm:$0xff]  ;;  %v721_v45 = vpack.c.bf16 %v685_v39, %v684_v38  ;;  %v655_v49 = vld [vmem:[%s2310_s11 + $0xc8] sm:$0xff] }
  0x23   : > { %v669_v43 = vld [vmem:[%s2310_s11 + $0x138] sm:$0xff]  ;;  %v697_v46 = vpack.c.bf16 %v637_v41, %v636_v40  ;;  %v686_v50 = vld [vmem:[%s2310_s11 + $0x1c0] sm:$0xff]  ;;  %v687_v51 = vld [vmem:[%s2310_s11 + $0x1c8] sm:$0xff]  ;;  %v706_v56 = vpack.c.bf16 %v655_v49, %v654_v48  ;;  %p2145_p0 = pneg %p2144_p13 }
  0x24   : > { %v713_v47 = vpack.c.bf16 %v669_v43, %v668_v42  ;;  %v638_v52 = vld [vmem:[%s2310_s11 + $0x40] sm:$0xff]  ;;  %v639_v53 = vld [vmem:[%s2310_s11 + $0x48] sm:$0xff]  ;;  %v722_v57 = vpack.c.bf16 %v687_v51, %v686_v50  ;;  %v656_v60 = vld [vmem:[%s2310_s11 + $0xd0] sm:$0xff] }
  0x25   : > { %v670_v54 = vld [vmem:[%s2310_s11 + $0x140] sm:$0xff]  ;;  %v671_v55 = vld [vmem:[%s2310_s11 + $0x148] sm:$0xff]  ;;  %v698_v58 = vpack.c.bf16 %v639_v53, %v638_v52  ;;  %v657_v61 = vld [vmem:[%s2310_s11 + $0xd8] sm:$0xff] }
  0x26   : > { %v714_v59 = vpack.c.bf16 %v671_v55, %v670_v54  ;;  %v688_v62 = vld [vmem:[%s2310_s11 + $0x1d0] sm:$0xff]  ;;  %v689_v63 = vld [vmem:[%s2310_s11 + $0x1d8] sm:$0xff]  ;;  %v707_v4 = vpack.c.bf16 %v657_v61, %v656_v60  ;;  %v417_v13 = vld [vmem:[%s2364_s14 + $0x160] sm:$0xff] }
  0x27   : > { %v640_v0 = vld [vmem:[%s2310_s11 + $0x50] sm:$0xff]  ;;  %v641_v1 = vld [vmem:[%s2310_s11 + $0x58] sm:$0xff]  ;;  %v723_v5 = vpack.c.bf16 %v689_v63, %v688_v62  ;;  %v418_v14 = vld [vmem:[%s2364_s14 + $0x168] sm:$0xff] }
  0x28   : > { %v672_v2 = vld [vmem:[%s2310_s11 + $0x150] sm:$0xff]  ;;  %v673_v3 = vld [vmem:[%s2310_s11 + $0x158] sm:$0xff]  ;;  %v699_v6 = vpack.c.bf16 %v641_v1, %v640_v0  ;;  %v1895_v16 = vpack.c.bf16 %v418_v14, %v417_v13  ;;  %v433_v17 = vld [vmem:[%s2364_s14 + $0x1e0] sm:$0xff] }
  0x29   : > { %v715_v7 = vpack.c.bf16 %v673_v3, %v672_v2  ;;  %v419_v8 = vld [vmem:[%s2364_s14 + $0x170] sm:$0xff]  ;;  %v420_v9 = vld [vmem:[%s2364_s14 + $0x178] sm:$0xff]  ;;  %v434_v18 = vld [vmem:[%s2364_s14 + $0x1e8] sm:$0xff] }
  0x2a   : > { %v435_v10 = vld [vmem:[%s2364_s14 + $0x1f0] sm:$0xff]  ;;  %v1900_v11 = vpack.c.bf16 %v420_v9, %v419_v8  ;;  %v436_v12 = vld [vmem:[%s2364_s14 + $0x1f8] sm:$0xff]  ;;  %1963 = vst [vmem:[#allocation2 + $0x70] sm:$0xff] %v1895_v16   ;;  %v2400_v36 = vld [vmem:[%s2310_s11 + $0x1e8] sm:$0xff] }
  0x2b   : > { %v1940_v15 = vpack.c.bf16 %v436_v12, %v435_v10  ;;  %v772_v19 = vld [vmem:[%s2370_s17 + $0x170] sm:$0xff]  ;;  %v741_v27 = vld [vmem:[%s2370_s17 + $0x78] sm:$0xff]  ;;  %v2406_v42 = vld [vmem:[%s2310_s11 + $0x60] sm:$0xff] }
  0x2c   : > { %2111 = vxpose.binary.xlu1.c.b16.cont [2/16] (narrow) %v703_v20, %v719_v21, 16  ;;  %1964 = vst [vmem:[#allocation2 + $0xc0] sm:$0xff] %v1900_v11   ;;  %v1935_v20 = vpack.c.bf16 %v434_v18, %v433_v17  ;;  %v773_v21 = vld [vmem:[%s2370_s17 + $0x178] sm:$0xff]  ;;  %v740_v26 = vld [vmem:[%s2370_s17 + $0x70] sm:$0xff]  ;;  %v643_v43 = vld [vmem:[%s2310_s11 + $0x68] sm:$0xff] }
  0x2d   : > { %1972 = vst [vmem:[#allocation2 + $0x98] sm:$0xff] %v1940_v15   ;;  %v813_v24 = vpack.c.bf16 %v773_v21, %v772_v19  ;;  %v788_v28 = vld [vmem:[%s2370_s17 + $0x1f0] sm:$0xff]  ;;  %v797_v29 = vpack.c.bf16 %v741_v27, %v740_v26  ;;  %v789_v30 = vld [vmem:[%s2370_s17 + $0x1f8] sm:$0xff]  ;;  %v770_v52 = vld [vmem:[%s2370_s17 + $0x160] sm:$0xff] }
  0x2e   : > { %2101 = vxpose.binary.xlu0.c.b16.cont [2/16] (narrow) %v695_v22, %v711_v23, 16  ;;  %v387_v22 = vld [vmem:[%s2364_s14 + $0x70] sm:$0xff]  ;;  %v388_v23 = vld [vmem:[%s2364_s14 + $0x78] sm:$0xff]  ;;  %1971 = vst [vmem:[#allocation2 + $0x20] sm:$0xff] %v1935_v20   ;;  %v821_v37 = vpack.c.bf16 %v789_v30, %v788_v28  ;;  %v771_v53 = vld [vmem:[%s2370_s17 + $0x168] sm:$0xff] }
  0x2f   : > { %v1820_v25 = vpack.c.bf16 %v388_v23, %v387_v22  ;;  %v403_v31 = vld [vmem:[%s2364_s14 + $0xf0] sm:$0xff]  ;;  %2013 = vmatpush.lsf.bf16.msrb.mxu2 %v813_v24  ;;  %v416_v40 = vld [vmem:[%s2364_s14 + $0x158] sm:$0xff]  ;;  %1979 = vmatpush.lsf.bf16.msrb.mxu0 %v797_v29  ;;  %v385_v54 = vld [vmem:[%s2364_s14 + $0x60] sm:$0xff]  ;;  %v812_v55 = vpack.c.bf16 %v771_v53, %v770_v52 }
  0x30   : > { %v415_v39 = vld [vmem:[%s2364_s14 + $0x150] sm:$0xff]  ;;  %v757_v49 = vld [vmem:[%s2370_s17 + $0xf8] sm:$0xff]  ;;  %2030 = vmatpush.lsf.bf16.msrb.mxu3 %v821_v37  ;;  %v786_v62 = vld [vmem:[%s2370_s17 + $0x1e0] sm:$0xff] }
  0x31   : > { %v431_v41 = vld [vmem:[%s2364_s14 + $0x1d0] sm:$0xff]  ;;  %1948 = vst [vmem:[#allocation2 + $0x48] sm:$0xff] %v1820_v25   ;;  %v787_v63 = vld [vmem:[%s2370_s17 + $0x1e8] sm:$0xff]  ;;  %v413_v10 = vld [vmem:[%s2364_s14 + $0x140] sm:$0xff] }
  0x32   : > { %v756_v48 = vld [vmem:[%s2370_s17 + $0xf0] sm:$0xff]  ;;  %v820_v3 = vpack.c.bf16 %v787_v63, %v786_v62  ;;  %v414_v11 = vld [vmem:[%s2364_s14 + $0x148] sm:$0xff]  ;;  %v429_v14 = vld [vmem:[%s2364_s14 + $0x1c0] sm:$0xff] }
  0x33   : > { %v805_v51 = vpack.c.bf16 %v757_v49, %v756_v48  ;;  %2014 = vmatpush.lsf.bf16.msrb.mxu2 %v812_v55  ;;  %v2434_v8 = vld [vmem:[#allocation2 + $0x70] sm:$0xff]  ;;  %v1885_v13 = vpack.c.bf16 %v414_v11, %v413_v10  ;;  %v430_v15 = vld [vmem:[%s2364_s14 + $0x1c8] sm:$0xff]  ;;  %v754_v18 = vld [vmem:[%s2370_s17 + $0xe0] sm:$0xff] }
  0x34   : > { %v2428_v2 = vld [vmem:[#allocation2 + $0x98] sm:$0xff]  ;;  %v1925_v17 = vpack.c.bf16 %v430_v15, %v429_v14  ;;  %v755_v19 = vld [vmem:[%s2370_s17 + $0xe8] sm:$0xff]  ;;  %v768_v22 = vld [vmem:[%s2370_s17 + $0x150] sm:$0xff] }
  0x35   : > { %1996 = vmatpush.lsf.bf16.msrb.mxu1 %v805_v51  ;;  %1120 = vmatpush.bf16.msra.mxu3 %v2428_v2  ;;  %v2439_v12 = vld [vmem:[#allocation2 + $0x20] sm:$0xff]  ;;  %1961 = vst [vmem:[#allocation2 + $0xe0] sm:$0xff] %v1885_v13   ;;  %v804_v21 = vpack.c.bf16 %v755_v19, %v754_v18  ;;  %v769_v23 = vld [vmem:[%s2370_s17 + $0x158] sm:$0xff]  ;;  %v383_v26 = vld [vmem:[%s2364_s14 + $0x50] sm:$0xff] }
  0x36   : > { %1969 = vst [vmem:[#allocation2 + $0xa0] sm:$0xff] %v1925_v17   ;;  %v811_v25 = vpack.c.bf16 %v769_v23, %v768_v22  ;;  %v384_v27 = vld [vmem:[%s2364_s14 + $0x58] sm:$0xff]  ;;  %v736_v30 = vld [vmem:[%s2370_s17 + $0x50] sm:$0xff]  ;;  %v766_v55 = vld [vmem:[%s2370_s17 + $0x140] sm:$0xff] }
  0x37   : > { %v1810_v29 = vpack.c.bf16 %v384_v27, %v383_v26  ;;  %v753_v48 = vld [vmem:[%s2370_s17 + $0xd8] sm:$0xff]  ;;  %v2480_v49 = vld [vmem:[%s2310_s11 + $0xf0] sm:$0xff]  ;;  %v397_v10 = vld [vmem:[%s2364_s14 + $0xc0] sm:$0xff] }
  0x38   : > { %v2443_v16 = vld [vmem:[#allocation2 + $0x48] sm:$0xff]  ;;  %v2486_v51 = vld [vmem:[%s2310_s11 + $0x1f0] sm:$0xff]  ;;  %v2489_v52 = vld [vmem:[%s2310_s11 + $0x1f8] sm:$0xff] }
  0x39   : > { %2031 = vmatpush.lsf.bf16.msrb.mxu3 %v820_v3  ;;  %1946 = vst [vmem:[#allocation2 + $0x68] sm:$0xff] %v1810_v29   ;;  %v398_v11 = vld [vmem:[%s2364_s14 + $0xc8] sm:$0xff]  ;;  %v409_v17 = vld [vmem:[%s2364_s14 + $0x120] sm:$0xff] }
  0x3a   : > { %v1845_v15 = vpack.c.bf16 %v398_v11, %v397_v10  ;;  %v410_v18 = vld [vmem:[%s2364_s14 + $0x128] sm:$0xff]  ;;  %v425_v23 = vld [vmem:[%s2364_s14 + $0x1a0] sm:$0xff] }
  0x3b   : > { %v1875_v22 = vpack.c.bf16 %v410_v18, %v409_v17  ;;  %v750_v26 = vld [vmem:[%s2370_s17 + $0xc0] sm:$0xff]  ;;  %v378_v10 = vld [vmem:[%s2364_s14 + $0x28] sm:$0xff] }
  0x3c   : > { %2112 = vxpose.binary.xlu1.c.b16.cont [3/16] (narrow) %v704_v32, %v720_v33, 16  ;;  %v404_v32 = vld [vmem:[%s2364_s14 + $0xf8] sm:$0xff]  ;;  %v2391_v33 = vld [vmem:[%s2310_s11 + $0xe0] sm:$0xff]  ;;  %1953 = vst [vmem:[#allocation2 + $0x60] sm:$0xff] %v1845_v15   ;;  %v731_v17 = vld [vmem:[%s2370_s17 + $0x28] sm:$0xff] }
  0x3d   : > { %v1860_v38 = vpack.c.bf16 %v404_v32, %v403_v31  ;;  %1121 = vmatpush.bf16.msra.mxu3 %v2439_v12  ;;  %v737_v31 = vld [vmem:[%s2370_s17 + $0x58] sm:$0xff]  ;;  %v2492_v53 = vld [vmem:[#allocation2 + $0xe0] sm:$0xff]  ;;  %1959 = vst [vmem:[#allocation2 + $0x40] sm:$0xff] %v1875_v22  }
  0x3e   : > { %2102 = vxpose.binary.xlu0.c.b16.cont [3/16] (narrow) %v696_v34, %v712_v35, 16  ;;  %v2394_v34 = vld [vmem:[%s2310_s11 + $0xe8] sm:$0xff]  ;;  %v2397_v35 = vld [vmem:[%s2310_s11 + $0x1e0] sm:$0xff]  ;;  %v795_v32 = vpack.c.bf16 %v737_v31, %v736_v30 }
  0x3f   : > { %1956 = vst [vmem:[#allocation2 + $0x78] sm:$0xff] %v1860_v38   ;;  %v708_v0 = vpack.c.bf16 %v2394_v34, %v2391_v33  ;;  %v724_v1 = vpack.c.bf16 %v2400_v36, %v2397_v35  ;;  %v784_v33 = vld [vmem:[%s2370_s17 + $0x1d0] sm:$0xff]  ;;  %v785_v34 = vld [vmem:[%s2370_s17 + $0x1d8] sm:$0xff]  ;;  %v2501_v62 = vld [vmem:[#allocation2 + $0xa0] sm:$0xff] }
  0x40   : > { %v399_v35 = vld [vmem:[%s2364_s14 + $0xd0] sm:$0xff]  ;;  %v819_v37 = vpack.c.bf16 %v785_v34, %v784_v33  ;;  %v400_v38 = vld [vmem:[%s2364_s14 + $0xd8] sm:$0xff]  ;;  %v2513_v13 = vld [vmem:[#allocation2 + $0x68] sm:$0xff] }
  0x41   : > { %v751_v31 = vld [vmem:[%s2370_s17 + $0xc8] sm:$0xff]  ;;  %v765_v33 = vld [vmem:[%s2370_s17 + $0x138] sm:$0xff]  ;;  %v730_v15 = vld [vmem:[%s2370_s17 + $0x20] sm:$0xff] }
  0x42   : > { %v792_v18 = vpack.c.bf16 %v731_v17, %v730_v15  ;;  %v393_v22 = vld [vmem:[%s2364_s14 + $0xa0] sm:$0xff] }
  0x46   : > { %v2447_v20 = vld [vmem:[#allocation2 + $0x78] sm:$0xff] }
  0x47   : > { %1092 = vmatpush.bf16.msra.mxu1 %v2447_v20 }
  0x4b   : > { %1997 = vmatpush.lsf.bf16.msrb.mxu1 %v804_v21  ;;  %v725_v21 = vpack.c.bf16 %v2489_v52, %v2486_v51  ;;  %v396_v51 = vld [vmem:[%s2364_s14 + $0xb8] sm:$0xff]  ;;  %v407_v52 = vld [vmem:[%s2364_s14 + $0x110] sm:$0xff] }
  0x4c   : > { %2113 = vxpose.binary.xlu1.c.b16.cont [4/16] (narrow) %v705_v44, %v721_v45, 16  ;;  %v674_v44 = vld [vmem:[%s2310_s11 + $0x160] sm:$0xff]  ;;  %v675_v45 = vld [vmem:[%s2310_s11 + $0x168] sm:$0xff] }
  0x4e   : > { %2103 = vxpose.binary.xlu0.c.b16.cont [4/16] (narrow) %v697_v46, %v713_v47, 16  ;;  %v1890_v46 = vpack.c.bf16 %v416_v40, %v415_v39  ;;  %v432_v47 = vld [vmem:[%s2364_s14 + $0x1d8] sm:$0xff]  ;;  %v411_v39 = vld [vmem:[%s2364_s14 + $0x130] sm:$0xff]  ;;  %v1850_v40 = vpack.c.bf16 %v400_v38, %v399_v35 }
  0x4f   : > { %v1930_v50 = vpack.c.bf16 %v432_v47, %v431_v41  ;;  %v412_v41 = vld [vmem:[%s2364_s14 + $0x138] sm:$0xff]  ;;  %v752_v47 = vld [vmem:[%s2370_s17 + $0xd0] sm:$0xff] }
  0x50   : > { %1962 = vst [vmem:[#allocation2 + $0x90] sm:$0xff] %v1890_v46   ;;  %v379_v35 = vld [vmem:[%s2364_s14 + $0x30] sm:$0xff] }
  0x51   : > { %1970 = vst [vmem:[#allocation2 + $0xf8] sm:$0xff] %v1930_v50   ;;  %v2483_v50 = vld [vmem:[%s2310_s11 + $0xf8] sm:$0xff] }
  0x52   : > { %1954 = vst [vmem:[#allocation2 + $0xf0] sm:$0xff] %v1850_v40   ;;  %v709_v19 = vpack.c.bf16 %v2483_v50, %v2480_v49  ;;  %v395_v50 = vld [vmem:[%s2364_s14 + $0xb0] sm:$0xff] }
  0x57   : > { %v2451_v24 = vld [vmem:[#allocation2 + $0x90] sm:$0xff] }
  0x58   : > { %v2457_v28 = vld [vmem:[#allocation2 + $0xf8] sm:$0xff] }
  0x59   : > { %1122 = vmatpush.bf16.msra.mxu3 %v2457_v28  ;;  %v2528_v34 = vld [vmem:[#allocation2 + $0xf0] sm:$0xff] }
  0x5c   : > { %2114 = vxpose.binary.xlu1.c.b16.cont [5/16] (narrow) %v706_v56, %v722_v57, 16  ;;  %v386_v56 = vld [vmem:[%s2364_s14 + $0x68] sm:$0xff]  ;;  %v738_v57 = vld [vmem:[%s2370_s17 + $0x60] sm:$0xff] }
  0x5d   : > { %v1815_v60 = vpack.c.bf16 %v386_v56, %v385_v54  ;;  %2032 = vmatpush.lsf.bf16.msrb.mxu3 %v819_v37  ;;  %v803_v54 = vpack.c.bf16 %v753_v48, %v752_v47  ;;  %v767_v56 = vld [vmem:[%s2370_s17 + $0x148] sm:$0xff]  ;;  %v380_v37 = vld [vmem:[%s2364_s14 + $0x38] sm:$0xff] }
  0x5e   : > { %2104 = vxpose.binary.xlu0.c.b16.cont [5/16] (narrow) %v698_v58, %v714_v59, 16  ;;  %v739_v58 = vld [vmem:[%s2370_s17 + $0x68] sm:$0xff]  ;;  %v2420_v59 = vld [vmem:[#allocation2 + $0xc0] sm:$0xff]  ;;  %v810_v63 = vpack.c.bf16 %v767_v56, %v766_v55  ;;  %v1800_v40 = vpack.c.bf16 %v380_v37, %v379_v35  ;;  %v781_v47 = vld [vmem:[%s2370_s17 + $0x1b8] sm:$0xff]  ;;  %v1840_v55 = vpack.c.bf16 %v396_v51, %v395_v50 }
  0x5f   : > { %v796_v61 = vpack.c.bf16 %v739_v58, %v738_v57  ;;  %1106 = vmatpush.bf16.msra.mxu2 %v2420_v59  ;;  %1947 = vst [vmem:[#allocation2 + $0x30] sm:$0xff] %v1815_v60   ;;  %v644_v57 = vld [vmem:[%s2310_s11 + $0x70] sm:$0xff]  ;;  %v645_v58 = vld [vmem:[%s2310_s11 + $0x78] sm:$0xff]  ;;  %v746_v37 = vld [vmem:[%s2370_s17 + $0xa0] sm:$0xff] }
  0x60   : > { %v676_v60 = vld [vmem:[%s2310_s11 + $0x170] sm:$0xff]  ;;  %v701_v27 = vpack.c.bf16 %v645_v58, %v644_v57  ;;  %1944 = vst [vmem:[#allocation2 + $0x18] sm:$0xff] %v1800_v40   ;;  %v408_v56 = vld [vmem:[%s2364_s14 + $0x118] sm:$0xff] }
  0x61   : > { %1980 = vmatpush.lsf.bf16.msrb.mxu0 %v796_v61  ;;  %v677_v61 = vld [vmem:[%s2310_s11 + $0x178] sm:$0xff]  ;;  %1123 = vmatpush.bf16.msra.mxu3 %v2501_v62  ;;  %v423_v57 = vld [vmem:[%s2364_s14 + $0x190] sm:$0xff]  ;;  %v1870_v58 = vpack.c.bf16 %v408_v56, %v407_v52  ;;  %1952 = vst [vmem:[#allocation2 + $0xb8] sm:$0xff] %v1840_v55   ;;  %s2146_s11 = scalar_lea.hbm %s2819_s5, 8 }
  0x62   : > { %v717_v29 = vpack.c.bf16 %v677_v61, %v676_v60  ;;  %v424_v60 = vld [vmem:[%s2364_s14 + $0x198] sm:$0xff]  ;;  %v748_v61 = vld [vmem:[%s2370_s17 + $0xb0] sm:$0xff]  ;;  %p2148_p2 = scmp.lt.s32.totalorder %s2146_s11, %s2142_s27 }
  0x63   : > { %1107 = vmatpush.bf16.msra.mxu2 %v2434_v8  ;;  %1958 = vst [vmem:[#allocation2 + $0x58] sm:$0xff] %v1870_v58   ;;  %v760_v40 = vld [vmem:[%s2370_s17 + $0x110] sm:$0xff]  ;;  %v376_v52 = vld [vmem:[%s2364_s14 + $0x18] sm:$0xff] }
  0x64   : > { %v375_v51 = vld [vmem:[%s2364_s14 + $0x10] sm:$0xff]  ;;  %v392_v58 = vld [vmem:[%s2364_s14 + $0x98] sm:$0xff]  ;;  %p2149_p3 = por %p2148_p2, %p2147_p1 }
  0x65   : > { %1078 = vmatpush.bf16.msra.mxu0 %v2443_v16  ;;  %v1790_v56 = vpack.c.bf16 %v376_v52, %v375_v51 }
  0x66   : > { %v2466_v36 = vld [vmem:[#allocation2 + $0x30] sm:$0xff]  ;;  %p2150_p5 = pnand %p2149_p3, %p2145_p0 }
  0x67   : > { %2015 = vmatpush.lsf.bf16.msrb.mxu2 %v811_v25  ;;  %v426_v25 = vld [vmem:[%s2364_s14 + $0x1a8] sm:$0xff]  ;;  %1942 = vst [vmem:[#allocation2] sm:$0xff] %v1790_v56  }
  0x68   : > { %v1915_v30 = vpack.c.bf16 %v426_v25, %v425_v23  ;;  %v2572_v23 = vld [vmem:[#allocation2 + $0x18] sm:$0xff] }
  0x69   : > { %1981 = vmatpush.lsf.bf16.msrb.mxu0 %v795_v32  ;;  %v764_v32 = vld [vmem:[%s2370_s17 + $0x130] sm:$0xff] }
  0x6a   : > { %1967 = vst [vmem:[#allocation2 + $0x10] sm:$0xff] %v1915_v30   ;;  %v406_v30 = vld [vmem:[%s2364_s14 + $0x108] sm:$0xff] }
  0x6b   : > { %1108 = vmatpush.bf16.msra.mxu2 %v2451_v24 }
  0x6c   : > { %2115 = vxpose.binary.xlu1.c.b16.cont [6/16] (narrow) %v707_v4, %v723_v5, 16  ;;  %v401_v4 = vld [vmem:[%s2364_s14 + $0xe0] sm:$0xff]  ;;  %v402_v5 = vld [vmem:[%s2364_s14 + $0xe8] sm:$0xff] }
  0x6d   : > { %v1855_v9 = vpack.c.bf16 %v402_v5, %v401_v4  ;;  %1079 = vmatpush.bf16.msra.mxu0 %v2466_v36  ;;  %v734_v4 = vld [vmem:[%s2370_s17 + $0x40] sm:$0xff]  ;;  %v735_v5 = vld [vmem:[%s2370_s17 + $0x48] sm:$0xff] }
  0x6e   : > { %2105 = vxpose.binary.xlu0.c.b16.cont [6/16] (narrow) %v699_v6, %v715_v7, 16  ;;  %v700_v6 = vpack.c.bf16 %v643_v43, %v2406_v42  ;;  %v716_v7 = vpack.c.bf16 %v675_v45, %v674_v44  ;;  %v427_v42 = vld [vmem:[%s2364_s14 + $0x1b0] sm:$0xff]  ;;  %v428_v43 = vld [vmem:[%s2364_s14 + $0x1b8] sm:$0xff]  ;;  %v1880_v45 = vpack.c.bf16 %v412_v41, %v411_v39  ;;  %v2616_v15 = vld [vmem:[#allocation2] sm:$0xff] }
  0x6f   : > { %1955 = vst [vmem:[#allocation2 + $0x8] sm:$0xff] %v1855_v9   ;;  %v1920_v46 = vpack.c.bf16 %v428_v43, %v427_v42  ;;  %1109 = vmatpush.bf16.msra.mxu2 %v2492_v53  ;;  %v783_v9 = vld [vmem:[%s2370_s17 + $0x1c8] sm:$0xff]  ;;  %v802_v39 = vpack.c.bf16 %v751_v31, %v750_v26  ;;  %v732_v41 = vld [vmem:[%s2370_s17 + $0x30] sm:$0xff]  ;;  %v733_v42 = vld [vmem:[%s2370_s17 + $0x38] sm:$0xff] }
  0x70   : > { %1960 = vst [vmem:[#allocation2 + $0xc8] sm:$0xff] %v1880_v45   ;;  %v809_v45 = vpack.c.bf16 %v765_v33, %v764_v32  ;;  %v793_v48 = vpack.c.bf16 %v733_v42, %v732_v41  ;;  %v394_v26 = vld [vmem:[%s2364_s14 + $0xa8] sm:$0xff]  ;;  %v421_v31 = vld [vmem:[%s2364_s14 + $0x180] sm:$0xff]  ;;  %v2583_v41 = vld [vmem:[#allocation2 + $0xb8] sm:$0xff] }
  0x71   : > { %1968 = vst [vmem:[#allocation2 + $0x28] sm:$0xff] %v1920_v46   ;;  %v780_v46 = vld [vmem:[%s2370_s17 + $0x1b0] sm:$0xff]  ;;  %v422_v32 = vld [vmem:[%s2364_s14 + $0x188] sm:$0xff] }
  0x72   : > { %v817_v49 = vpack.c.bf16 %v781_v47, %v780_v46  ;;  %v2563_v11 = vld [vmem:[#allocation2 + $0x10] sm:$0xff]  ;;  %v1905_v35 = vpack.c.bf16 %v422_v32, %v421_v31  ;;  %v2586_v46 = vld [vmem:[#allocation2 + $0x58] sm:$0xff]  ;;  %v727_v32 = vld [vmem:[%s2370_s17 + $0x8] sm:$0xff] }
  0x73   : > { %2016 = vmatpush.lsf.bf16.msrb.mxu2 %v810_v63  ;;  %v749_v63 = vld [vmem:[%s2370_s17 + $0xb8] sm:$0xff] }
  0x74   : > { %1965 = vst [vmem:[#allocation2 + $0xa8] sm:$0xff] %v1905_v35   ;;  %v775_v35 = vld [vmem:[%s2370_s17 + $0x188] sm:$0xff] }
  0x76   : > { %v2475_v44 = vld [vmem:[#allocation2 + $0x8] sm:$0xff] }
  0x77   : > { %1093 = vmatpush.bf16.msra.mxu1 %v2475_v44  ;;  %v2532_v38 = vld [vmem:[#allocation2 + $0xc8] sm:$0xff] }
  0x78   : > { %v2536_v43 = vld [vmem:[#allocation2 + $0x28] sm:$0xff]  ;;  %1110 = vmatpush.bf16.msra.mxu2 %v2532_v38 }
  0x7b   : > { %1998 = vmatpush.lsf.bf16.msrb.mxu1 %v803_v54 }
  0x7c   : > { %2116 = vxpose.binary.xlu1.c.b16.cont [7/16] (narrow) %v708_v0, %v724_v1, 16  ;;  %v381_v0 = vld [vmem:[%s2364_s14 + $0x40] sm:$0xff]  ;;  %v382_v1 = vld [vmem:[%s2364_s14 + $0x48] sm:$0xff] }
  0x7d   : > { %v1805_v3 = vpack.c.bf16 %v382_v1, %v381_v0  ;;  %v2554_v0 = vld [vmem:[#allocation2 + $0x60] sm:$0xff]  ;;  %2017 = vmatpush.lsf.bf16.msrb.mxu2 %v809_v45  ;;  %v1910_v1 = vpack.c.bf16 %v424_v60, %v423_v57  ;;  %v761_v45 = vld [vmem:[%s2370_s17 + $0x118] sm:$0xff]  ;;  %v391_v57 = vld [vmem:[%s2364_s14 + $0x90] sm:$0xff] }
  0x7e   : > { %2106 = vxpose.binary.xlu0.c.b16.cont [7/16] (narrow) %v700_v6, %v716_v7, 16  ;;  %v782_v6 = vld [vmem:[%s2370_s17 + $0x1c0] sm:$0xff]  ;;  %v794_v7 = vpack.c.bf16 %v735_v5, %v734_v4  ;;  %v763_v5 = vld [vmem:[%s2370_s17 + $0x128] sm:$0xff]  ;;  %v807_v47 = vpack.c.bf16 %v761_v45, %v760_v40 }
  0x7f   : > { %1945 = vst [vmem:[#allocation2 + $0x50] sm:$0xff] %v1805_v3   ;;  %v818_v14 = vpack.c.bf16 %v783_v9, %v782_v6  ;;  %1094 = vmatpush.bf16.msra.mxu1 %v2528_v34  ;;  %v801_v3 = vpack.c.bf16 %v749_v63, %v748_v61  ;;  %v762_v4 = vld [vmem:[%s2370_s17 + $0x120] sm:$0xff]  ;;  %v2605_v60 = vld [vmem:[#allocation2 + $0xa8] sm:$0xff]  ;;  %v1830_v61 = vpack.c.bf16 %v392_v58, %v391_v57 }
  0x80   : > { %1982 = vmatpush.lsf.bf16.msrb.mxu0 %v794_v7  ;;  %v2558_v6 = vld [vmem:[#allocation2 + $0x40] sm:$0xff]  ;;  %v808_v7 = vpack.c.bf16 %v763_v5, %v762_v4  ;;  %1966 = vst [vmem:[#allocation2 + $0xd0] sm:$0xff] %v1910_v1   ;;  %v374_v1 = vld [vmem:[%s2364_s14 + $0x8] sm:$0xff] }
  0x81   : > { %2033 = vmatpush.lsf.bf16.msrb.mxu3 %v818_v14  ;;  %v377_v9 = vld [vmem:[%s2364_s14 + $0x20] sm:$0xff]  ;;  %1111 = vmatpush.bf16.msra.mxu2 %v2558_v6  ;;  %1950 = vst [vmem:[#allocation2 + $0x88] sm:$0xff] %v1830_v61   ;;  %v390_v5 = vld [vmem:[%s2364_s14 + $0x88] sm:$0xff] }
  0x82   : > { %v1795_v14 = vpack.c.bf16 %v378_v10, %v377_v9  ;;  %v373_v63 = vld [vmem:[%s2364_s14] sm:$0xff]  ;;  %v728_v9 = vld [vmem:[%s2370_s17 + $0x10] sm:$0xff]  ;;  %v729_v10 = vld [vmem:[%s2370_s17 + $0x18] sm:$0xff] }
  0x83   : > { %1999 = vmatpush.lsf.bf16.msrb.mxu1 %v802_v39  ;;  %v747_v39 = vld [vmem:[%s2370_s17 + $0xa8] sm:$0xff]  ;;  %v389_v4 = vld [vmem:[%s2364_s14 + $0x80] sm:$0xff]  ;;  %v791_v17 = vpack.c.bf16 %v729_v10, %v728_v9  ;;  %v1262_v10 = vlaneseq }
  0x84   : > { %1080 = vmatpush.bf16.msra.mxu0 %v2513_v13  ;;  %1943 = vst [vmem:[#allocation2 + $0xd8] sm:$0xff] %v1795_v14   ;;  %v800_v42 = vpack.c.bf16 %v747_v39, %v746_v37  ;;  %v776_v14 = vld [vmem:[%s2370_s17 + $0x190] sm:$0xff]  ;;  %v743_v45 = vld [vmem:[%s2370_s17 + $0x88] sm:$0xff] }
  0x85   : > { %1124 = vmatpush.bf16.msra.mxu3 %v2536_v43  ;;  %2018 = vmatpush.lsf.bf16.msrb.mxu2 %v808_v7  ;;  %v1825_v7 = vpack.c.bf16 %v390_v5, %v389_v4 }
  0x86   : > { %v2545_v54 = vld [vmem:[#allocation2 + $0x50] sm:$0xff] }
  0x87   : > { %1095 = vmatpush.bf16.msra.mxu1 %v2554_v0  ;;  %1949 = vst [vmem:[#allocation2 + $0x80] sm:$0xff] %v1825_v7  }
  0x88   : > { %1081 = vmatpush.bf16.msra.mxu0 %v2545_v54 }
  0x89   : > { %2034 = vmatpush.lsf.bf16.msrb.mxu3 %v817_v49  ;;  %1112 = vmatpush.bf16.msra.mxu2 %v2586_v46 }
  0x8b   : > { %2000 = vmatpush.lsf.bf16.msrb.mxu1 %v801_v3  ;;  %v2593_v49 = vld [vmem:[#allocation2 + $0xd8] sm:$0xff]  ;;  %v1785_v3 = vpack.c.bf16 %v374_v1, %v373_v63 }
  0x8c   : > { %2117 = vxpose.binary.xlu1.c.b16.end [8/16] (narrow) %v709_v19, %v725_v21, 16  ;;  %v778_v19 = vld [vmem:[%s2370_s17 + $0x1a0] sm:$0xff]  ;;  %v779_v21 = vld [vmem:[%s2370_s17 + $0x1a8] sm:$0xff] }
  0x8d   : > { %1983 = vmatpush.lsf.bf16.msrb.mxu0 %v793_v48  ;;  %1125 = vmatpush.bf16.msra.mxu3 %v2563_v11  ;;  %v816_v25 = vpack.c.bf16 %v779_v21, %v778_v19  ;;  %v2589_v48 = vld [vmem:[#allocation2 + $0xd0] sm:$0xff]  ;;  %1786 = vst [vmem:[#allocation2 + $0xb0] sm:$0xff] %v1785_v3   ;;  %v2619_v21 = vld [vmem:[#allocation2 + $0x88] sm:$0xff] }
  0x8e   : > { %2107 = vxpose.binary.xlu0.c.b16.end [8/16] (narrow) %v701_v27, %v717_v29, 16  ;;  %v405_v27 = vld [vmem:[%s2364_s14 + $0x100] sm:$0xff]  ;;  %v1835_v29 = vpack.c.bf16 %v394_v26, %v393_v22  ;;  %v744_v22 = vld [vmem:[%s2370_s17 + $0x90] sm:$0xff] }
  0x8f   : > { %v1865_v33 = vpack.c.bf16 %v406_v30, %v405_v27  ;;  %1096 = vmatpush.bf16.msra.mxu1 %v2583_v41  ;;  %2019 = vmatpush.lsf.bf16.msrb.mxu2 %v807_v47  ;;  %v758_v27 = vld [vmem:[%s2370_s17 + $0x100] sm:$0xff] }
  0x90   : > { %1951 = vst [vmem:[#allocation2 + $0xe8] sm:$0xff] %v1835_v29   ;;  %v759_v29 = vld [vmem:[%s2370_s17 + $0x108] sm:$0xff]  ;;  %v726_v30 = vld [vmem:[%s2370_s17] sm:$0xff] }
  0x91   : > { %1984 = vmatpush.lsf.bf16.msrb.mxu0 %v792_v18  ;;  %2035 = vmatpush.lsf.bf16.msrb.mxu3 %v816_v25  ;;  %1957 = vst [vmem:[#allocation2 + $0x38] sm:$0xff] %v1865_v33   ;;  %v777_v18 = vld [vmem:[%s2370_s17 + $0x198] sm:$0xff]  ;;  %v806_v31 = vpack.c.bf16 %v759_v29, %v758_v27  ;;  %v774_v33 = vld [vmem:[%s2370_s17 + $0x180] sm:$0xff]  ;;  %v790_v39 = vpack.c.bf16 %v727_v32, %v726_v30 }
  0x92   : > { %v815_v19 = vpack.c.bf16 %v777_v18, %v776_v14  ;;  %v745_v25 = vld [vmem:[%s2370_s17 + $0x98] sm:$0xff]  ;;  %v814_v40 = vpack.c.bf16 %v775_v35, %v774_v33  ;;  %v1758_v47 = vld [vmem:[#allocation2 + $0x80] sm:$0xff] }
  0x93   : > { %2001 = vmatpush.lsf.bf16.msrb.mxu1 %v800_v42  ;;  %v799_v26 = vpack.c.bf16 %v745_v25, %v744_v22  ;;  %v742_v42 = vld [vmem:[%s2370_s17 + $0x80] sm:$0xff]  ;;  %s1455_s17 = sshll.u32 %s2684_s10, 4  ;;  %s1456_s17 = int_to_ptr.vmem [resolvable:$true] %s1455_s17 }
  0x94   : > { %v2631_v37 = vld [vmem:[#allocation2 + $0xb0] sm:$0xff]  ;;  %v798_v51 = vpack.c.bf16 %v743_v45, %v742_v42 }
  0x95   : > { %1082 = vmatpush.bf16.msra.mxu0 %v2572_v23  ;;  %1126 = vmatpush.bf16.msra.mxu3 %v2589_v48 }
  0x97   : > { %v2596_v50 = vld [vmem:[#allocation2 + $0xe8] sm:$0xff] }
  0x98   : > { %v2600_v55 = vld [vmem:[#allocation2 + $0x38] sm:$0xff]  ;;  %1097 = vmatpush.bf16.msra.mxu1 %v2596_v50 }
  0x99   : > { %1083 = vmatpush.bf16.msra.mxu0 %v2593_v49  ;;  %1113 = vmatpush.bf16.msra.mxu2 %v2600_v55 }
  0x9a   : > { %1127 = vmatpush.bf16.msra.mxu3 %v2605_v60 }
  0x9c   : > { %1098 = vmatpush.bf16.msra.mxu1 %v2619_v21 }
  0x9d   : > { %1084 = vmatpush.bf16.msra.mxu0 %v2616_v15  ;;  %2020 = vmatpush.lsf.bf16.msrb.mxu2 %v806_v31 }
  0x9e   : > { %2036 = vmatpush.lsf.bf16.msrb.mxu3 %v815_v19 }
  0x9f   : > { %2021 = vllmr.2.mxu2 }
  0xa0   : > { %2002 = vmatpush.lsf.bf16.msrb.mxu1 %v799_v26 }
  0xa1   : > { %1985 = vmatpush.lsf.bf16.msrb.mxu0 %v791_v17 }
  0xa2   : > { %2037 = vmatpush.lsf.bf16.msrb.mxu3 %v814_v40 }
  0xa4   : > { %1099 = vmatpush.bf16.msra.mxu1 %v1758_v47  ;;  %2038 = vllmr.2.mxu3 }
  0xa5   : > { %1085 = vmatpush.bf16.msra.mxu0 %v2631_v37 }
  0xa8   : > { %2003 = vmatpush.lsf.bf16.msrb.mxu1 %v798_v51  ;;  %v2208_v51 = vmov 1  }
  0xa9   : > { %1986 = vmatpush.lsf.bf16.msrb.mxu0 %v790_v39 }
  0xaa   : > { %2004 = vllmr.2.mxu1 }
  0xab   : > { %1987 = vllmr.2.mxu0 }
  0xc8   : > { %v2118_v52 = vpop.trf.xlu1 }
  0xc9   : > { %1128 = vmatmul.bf16.vlgmr.msra.gmra.mxu3 %v2118_v52 }
  0xca   : > { %v2108_v56 = vpop.trf.xlu0  ;;  %1242 = vmatpush.bf16.msra.mxu3 %v2428_v2  ;;  %v2206_v2 = vmov 0  }
  0xcb   : > { %1114 = vmatmul.bf16.vlgmr.msra.gmra.mxu2 %v2108_v56  ;;  %2120 = vset.pattern.permute.xlu2 %v2206_v2  ;;  %v2209_v56 = vmov 0.0  }
  0xcc   : > { %1228 = vmatpush.bf16.msra.mxu2 %v2420_v59  ;;  %v2655_v59 = vld [vmem:[%s357_s29] sm:$0xff] }
  0xcd   : > { %1267 = vperm.xlu2 %2120, %v2655_v59  }
  0xce   : > { %1243 = vmatpush.bf16.msra.mxu3 %v2439_v12  ;;  %v2207_v12 = vmov -1e+30  }
  0xcf   : > { %565 = vst [vmem:[%s2684_s10] sm:$0xf] %v2207_v12 }
  0xd0   : > { %1229 = vmatpush.bf16.msra.mxu2 %v2434_v8  ;;  %v2119_v57 = vpop.trf.xlu1  ;;  %v2668_v8 = vld [vmem:[%s357_s29 + $0x8] sm:$0xff] }
  0xd1   : > { %1100 = vmatmul.bf16.vlgmr.msra.gmra.mxu1 %v2119_v57 }
  0xd2   : > { %v2109_v58 = vpop.trf.xlu0  ;;  %1214 = vmatpush.bf16.msra.mxu1 %v2447_v20  ;;  %1244 = vmatpush.bf16.msra.mxu3 %v2457_v28 }
  0xd3   : > { %1086 = vmatmul.bf16.vlgmr.msra.gmra.mxu0 %v2109_v58 }
  0xd4   : > { %1200 = vmatpush.bf16.msra.mxu0 %v2443_v16  ;;  %1230 = vmatpush.bf16.msra.mxu2 %v2451_v24 }
  0xd5   : > { %1272 = vperm.xlu2 %2120, %v2668_v8  }
  0xd6   : > { %1215 = vmatpush.bf16.msra.mxu1 %v2475_v44  ;;  %1245 = vmatpush.bf16.msra.mxu3 %v2501_v62  ;;  %v1430_v5 = vld [vmem:[%s2684_s10] sm:$0x1] }
  0xd8   : > { %1201 = vmatpush.bf16.msra.mxu0 %v2466_v36  ;;  %1231 = vmatpush.bf16.msra.mxu2 %v2492_v53 }
  0xda   : > { %1216 = vmatpush.bf16.msra.mxu1 %v2528_v34  ;;  %1246 = vmatpush.bf16.msra.mxu3 %v2536_v43 }
  0xdc   : > { %1202 = vmatpush.bf16.msra.mxu0 %v2513_v13  ;;  %1232 = vmatpush.bf16.msra.mxu2 %v2532_v38 }
  0xdd   : > { %2121 = vset.pattern.permute.xlu2 %v2208_v51 }
  0xde   : > { %1217 = vmatpush.bf16.msra.mxu1 %v2554_v0  ;;  %1247 = vmatpush.bf16.msra.mxu3 %v2563_v11 }
  0xdf   : > { %2123 = vset.pattern.permute.xlu1 %v2206_v2 }
  0xe0   : > { %1203 = vmatpush.bf16.msra.mxu0 %v2545_v54  ;;  %1233 = vmatpush.bf16.msra.mxu2 %v2558_v6 }
  0xe2   : > { %1218 = vmatpush.bf16.msra.mxu1 %v2583_v41  ;;  %1248 = vmatpush.bf16.msra.mxu3 %v2589_v48 }
  0xe4   : > { %1204 = vmatpush.bf16.msra.mxu0 %v2572_v23  ;;  %1234 = vmatpush.bf16.msra.mxu2 %v2586_v46 }
  0xe6   : > { %1219 = vmatpush.bf16.msra.mxu1 %v2596_v50  ;;  %1249 = vmatpush.bf16.msra.mxu3 %v2605_v60 }
  0xe8   : > { %1205 = vmatpush.bf16.msra.mxu0 %v2593_v49  ;;  %1235 = vmatpush.bf16.msra.mxu2 %v2600_v55 }
  0xe9   : > { %2039 = vmatmul.lmr.bf16.vlgmr.msra.gmra.2.mxu3 }
  0xea   : > { %1220 = vmatpush.bf16.msra.mxu1 %v2619_v21  ;;  %v1263_v21 = vand.u32 127, %v1262_v10 }
  0xeb   : > { %2022 = vmatmul.lmr.bf16.vlgmr.msra.gmra.2.mxu2 }
  0xec   : > { %1206 = vmatpush.bf16.msra.mxu0 %v2616_v15  ;;  %vm1264_vm0 = vcmp.lt.s32.totalorder %v1263_v21, 16 }
  0xee   : > { %1221 = vmatpush.bf16.msra.mxu1 %v1758_v47 }
  0xf0   : > { %1207 = vmatpush.bf16.msra.mxu0 %v2631_v37 }
  0xf1   : > { %2005 = vmatmul.lmr.bf16.vlgmr.msra.gmra.2.mxu1  ;;  %2040 = vmatmul.lmr.bf16.gmra.2.mxu3 }
  0xf3   : > { %1988 = vmatmul.lmr.bf16.vlgmr.msra.gmra.2.mxu0  ;;  %2023 = vmatmul.lmr.bf16.gmra.2.mxu2 }
  0xf5   : > { %2125 = vset.pattern.permute.xlu0 %v2208_v51 }
  0xf9   : > { %2006 = vmatmul.lmr.bf16.gmra.2.mxu1 }
  0xfb   : > { %1989 = vmatmul.lmr.bf16.gmra.2.mxu0 }
 0x127   : > { %v1268_v53 = vpop.permute.xlu2 %1267 }
 0x12f   : > { %v1273_v46 = vpop.permute.xlu2 %1272 }
 0x14c   : > { %v1129_v44 = vpop.f32.mrf.mxu3 }
 0x14e   : > { %v1101_v20 = vpop.f32.mrf.mxu1  ;;  %v1115_v28 = vpop.f32.mrf.mxu2 }
 0x150   : > { %v1087_v16 = vpop.f32.mrf.mxu0 }
 0x151   : > { %v1088_v24 = vadd.f32 1.0, %v1087_v16 }
 0x153   : > { %v1102_v36 = vadd.f32 %v1101_v20, %v1088_v24  ;;  %v1260_v24 = vld [vmem:[%s2736_s13] sm:$0xff] }
 0x154   : > { %v1131_v11 = vpop.f32.mrf.mxu3 }
 0x155   : > { %v1116_v62 = vadd.f32 %v1115_v28, %v1102_v36 }
 0x156   : > { %v1103_v38 = vpop.f32.mrf.mxu1  ;;  %v1117_v0 = vpop.f32.mrf.mxu2 }
 0x157   : > { %v1130_v54 = vadd.f32 %v1129_v44, %v1116_v62 }
 0x158   : > { %v1089_v13 = vpop.f32.mrf.mxu0 }
 0x159   : > { %v1090_v34 = vadd.f32 1.0, %v1089_v13  ;;  %v2687_v23 = vmul.f32 0.5, %v1130_v54 }
 0x15b   : > { %v1104_v43 = vadd.f32 %v1103_v38, %v1090_v34  ;;  %v1275_v49 = vmul.f32 %v1268_v53, %v2687_v23 }
 0x15d   : > { %v1118_v6 = vadd.f32 %v1117_v0, %v1104_v43 }
 0x15f   : > { %v1132_v41 = vadd.f32 %v1131_v11, %v1118_v6 }
 0x161   : > { %v2689_v48 = vmul.f32 0.5, %v1132_v41 }
 0x163   : > { %v1276_v50 = vmul.f32 %v1273_v46, %v2689_v48  ;;  %v1433_v46 = vld [vmem:[%s2684_s10 + $0x1] sm:$0x1] }
 0x165   : > { %v1277_v55 = vmax.f32 %v1275_v49, %v1276_v50 }
 0x167   : > { %v1278_v60 = vrot.slane %v1277_v55, 4 }
 0x169   : > { %v1279_v61 = vmax.f32 %v1277_v55, %v1278_v60 }
 0x16b   : > { %v1280_v63 = vrot.slane %v1279_v61, 2 }
 0x16c   : > { %v1251_v17 = vpop.f32.mrf.mxu3 }
 0x16d   : > { %v1281_v1 = vmax.f32 %v1279_v61, %v1280_v63 }
 0x16e   : > { %v1223_v4 = vpop.f32.mrf.mxu1  ;;  %v1237_v9 = vpop.f32.mrf.mxu2 }
 0x16f   : > { %v1282_v3 = vrot.slane %v1281_v1, 1 }
 0x170   : > { %v1209_v7 = vpop.f32.mrf.mxu0 }
 0x171   : > { %v1283_v14 = vmax.f32 %v1281_v1, %v1282_v3  ;;  %v1210_v15 = vadd.f32 1.0, %v1209_v7 }
 0x173   : > { %v1431_v18 = vmax.f32 %v1430_v5, %v1283_v14  ;;  %v1224_v19 = vadd.f32 %v1223_v4, %v1210_v15 }
 0x174   : > { %v1253_v35 = vpop.f32.mrf.mxu3 }
 0x175   : > { %1432 = vst [vmem:[%s2684_s10] sm:$0x1] %v1431_v18  ;;  %v1238_v22 = vadd.f32 %v1237_v9, %v1224_v19  ;;  %v1261_v9 = vld [vmem:[%s2736_s13 + $0x8] sm:$0xff] }
 0x176   : > { %v1225_v27 = vpop.f32.mrf.mxu1  ;;  %v1239_v31 = vpop.f32.mrf.mxu2 }
 0x177   : > { %v1252_v25 = vadd.f32 %v1251_v17, %v1238_v22 }
 0x178   : > { %v1211_v26 = vpop.f32.mrf.mxu0 }
 0x179   : > { %v2695_v29 = vmul.f32 0.5, %v1252_v25  ;;  %v1212_v30 = vadd.f32 1.0, %v1211_v26 }
 0x17b   : > { %v2699_v32 = vsel %vm1264_vm0, %v2695_v29, -1e+30  ;;  %v1226_v33 = vadd.f32 %v1225_v27, %v1212_v30  ;;  %v1384_v16 = vsel %vm1264_vm0, %v2695_v29, 1e+30 }
 0x17c   : > { %1305 = vmax.xlane.f32.xlu2 %v2699_v32 }
 0x17d   : > { %v1240_v37 = vadd.f32 %v1239_v31, %v1226_v33 }
 0x17f   : > { %v1254_v39 = vadd.f32 %v1253_v35, %v1240_v37 }
 0x181   : > { %v2702_v40 = vmul.f32 0.5, %v1254_v39 }
 0x183   : > { %v2706_v42 = vsel %vm1264_vm0, %v2702_v40, -1e+30  ;;  %v1385_v20 = vsel %vm1264_vm0, %v2702_v40, 1e+30 }
 0x184   : > { %1307 = vmax.xlane.f32.xlu2 %v2706_v42 }
 0x1ef   : > { %v2709_v45 = vpop.xlane.xlu2 %1305 }
 0x1f0   : > { %vm1324_vm1 = vcmp.lt.f32.partialorder %v2699_v32, %v2709_v45  ;;  %vm1309_vm2 = vcmp.eq.f32.partialorder %v2699_v32, %v2709_v45 }
 0x1f1   : > { %v1326_v47 = vsel %vm1324_vm1, %v2699_v32, -1e+30  ;;  %v1311_v57 = vsel %vm1309_vm2, 1.0, %v2209_v56 }
 0x1f2   : > { %1328 = vmax.xlane.f32.xlu2 %v1326_v47 }
 0x1f7   : > { %v2716_v52 = vpop.xlane.xlu2 %1307 }
 0x1f8   : > { %vm1310_vm3 = vcmp.eq.f32.partialorder %v2706_v42, %v2716_v52  ;;  %vm1325_vm4 = vcmp.lt.f32.partialorder %v2706_v42, %v2716_v52 }
 0x1f9   : > { %v1312_v58 = vsel %vm1310_vm3, 1.0, %v2209_v56  ;;  %v1327_v12 = vsel %vm1325_vm4, %v2706_v42, -1e+30 }
 0x1fa   : > { %1313 = vadd.xlane.f32.xlu2 %v1311_v57  ;;  %1315 = vadd.xlane.f32.xlu0 %v1312_v58 }
 0x202   : > { %1330 = vmax.xlane.f32.xlu2 %v1327_v12 }
 0x20a   : > { %1386 = vmin.xlane.f32.xlu2 %v1384_v16 }
 0x212   : > { %1388 = vmin.xlane.f32.xlu2 %v1385_v20 }
 0x22a   : > { %1285 = vperm.xlu2 %2121, %v2655_v59  }
 0x232   : > { %1289 = vperm.xlu2 %2121, %v2668_v8  }
 0x23a   : > { %2122 = vset.pattern.permute.xlu2 %v2206_v2 }
 0x23b   : > { %1396 = vperm.xlu2 %2122, %v1260_v24  }
 0x243   : > { %2124 = vset.pattern.permute.xlu2 %v2208_v51 }
 0x265   : > { %v1329_v28 = vpop.xlane.xlu2 %1328 }
 0x266   : > { %vm1348_vm5 = vcmp.lt.f32.partialorder %v2699_v32, %v1329_v28  ;;  %vm1332_vm6 = vcmp.eq.f32.partialorder %v1326_v47, %v1329_v28 }
 0x267   : > { %v1350_v59 = vsel %vm1348_vm5, %v2699_v32, -1e+30  ;;  %v1334_v8 = vsel %vm1332_vm6, 1.0, %v2209_v56 }
 0x268   : > { %1352 = vmax.xlane.f32.xlu2 %v1350_v59  ;;  %1336 = vadd.xlane.f32.xlu1 %v1334_v8 }
 0x26d   : > { %v1314_v36 = vpop.xlane.xlu2 %1313  ;;  %v1316_v17 = vpop.xlane.xlu0 %1315 }
 0x26e   : > { %vm1340_vm9 = vcmp.lt.f32.partialorder %v1314_v36, 4.0  ;;  %vm1341_vm15 = vcmp.lt.f32.partialorder %v1316_v17, 4.0 }
 0x26f   : > { %v1342_v4 = vsel %vm1340_vm9, %v1329_v28, %v2709_v45 }
 0x275   : > { %v1331_v44 = vpop.xlane.xlu2 %1330 }
 0x276   : > { %vm1349_vm7 = vcmp.lt.f32.partialorder %v2706_v42, %v1331_v44  ;;  %vm1333_vm8 = vcmp.eq.f32.partialorder %v1327_v12, %v1331_v44  ;;  %v1343_v25 = vsel %vm1341_vm15, %v1331_v44, %v2716_v52 }
 0x277   : > { %v1351_v55 = vsel %vm1349_vm7, %v2706_v42, -1e+30 }
 0x27d   : > { %v2743_v53 = vpop.xlane.xlu2 %1386 }
 0x280   : > { %1414 = vperm.xlu2 %2124, %v1260_v24  }
 0x281   : > { %1401 = vperm.xlu1 %2123, %v1261_v9  }
 0x285   : > { %v2745_v2 = vpop.xlane.xlu2 %1388 }
 0x28d   : > { %v1286_v62 = vpop.permute.xlu2 %1285 }
 0x28e   : > { %v1292_v34 = vmul.f32 %v1286_v62, %v2687_v23  ;;  %v1335_v23 = vsel %vm1333_vm8, 1.0, %v2209_v56 }
 0x295   : > { %v1290_v13 = vpop.permute.xlu2 %1289 }
 0x296   : > { %v1293_v38 = vmul.f32 %v1290_v13, %v2689_v48 }
 0x298   : > { %v1294_v43 = vmax.f32 %v1292_v34, %v1293_v38 }
 0x29a   : > { %v1295_v54 = vrot.slane %v1294_v43, 4 }
 0x29c   : > { %v1296_v0 = vmax.f32 %v1294_v43, %v1295_v54  ;;  %v1439_v43 = vld [vmem:[%s2684_s10 + $0x3] sm:$0x1] }
 0x29d   : > { %v1397_v48 = vpop.permute.xlu2 %1396 }
 0x29e   : > { %v1297_v6 = vrot.slane %v1296_v0, 2 }
 0x2a0   : > { %v1298_v11 = vmax.f32 %v1296_v0, %v1297_v6 }
 0x2a2   : > { %v1299_v41 = vrot.slane %v1298_v11, 1 }
 0x2a4   : > { %v1300_v49 = vmax.f32 %v1298_v11, %v1299_v41 }
 0x2a6   : > { %v1434_v50 = vmax.f32 %v1433_v46, %v1300_v49 }
 0x2a8   : > { %1435 = vst [vmem:[%s2684_s10 + $0x1] sm:$0x1] %v1434_v50 }
 0x2a9   : > { %1354 = vmax.xlane.f32.xlu2 %v1351_v55 }
 0x2b1   : > { %1338 = vadd.xlane.f32.xlu2 %v1335_v23 }
 0x2db   : > { %v1337_v60 = vpop.xlane.xlu1 %1336  ;;  %v1353_v61 = vpop.xlane.xlu2 %1352 }
 0x2dc   : > { %v1344_v63 = vsel %vm1340_vm9, %v1337_v60, 0.0  ;;  %vm1356_vm10 = vcmp.eq.f32.partialorder %v1350_v59, %v1353_v61  ;;  %vm1372_vm12 = vcmp.lt.f32.partialorder %v2699_v32, %v1353_v61 }
 0x2dd   : > { %v1346_v1 = vadd.f32 %v1344_v63, %v1314_v36  ;;  %v1358_v3 = vsel %vm1356_vm10, 1.0, %v2209_v56  ;;  %v1374_v7 = vsel %vm1372_vm12, %v2699_v32, -1e+30 }
 0x2de   : > { %1360 = vadd.xlane.f32.xlu2 %v1358_v3 }
 0x2df   : > { %vm1364_vm11 = vcmp.lt.f32.partialorder %v1346_v1, 4.0 }
 0x2e0   : > { %v1366_v5 = vsel %vm1364_vm11, %v1353_v61, %v1342_v4 }
 0x2e3   : > { %v1415_v10 = vpop.permute.xlu2 %1414 }
 0x2e6   : > { %1376 = vmax.xlane.f32.xlu2 %v1374_v7 }
 0x2f3   : > { %v1402_v51 = vpop.permute.xlu1 %1401 }
 0x31c   : > { %v1355_v14 = vpop.xlane.xlu2 %1354 }
 0x31d   : > { %vm1357_vm13 = vcmp.eq.f32.partialorder %v1351_v55, %v1355_v14  ;;  %vm1373_vm14 = vcmp.lt.f32.partialorder %v2706_v42, %v1355_v14 }
 0x31e   : > { %v1359_v15 = vsel %vm1357_vm13, 1.0, %v2209_v56  ;;  %v1375_v22 = vsel %vm1373_vm14, %v2706_v42, -1e+30 }
 0x31f   : > { %1362 = vadd.xlane.f32.xlu2 %v1359_v15 }
 0x324   : > { %v1339_v18 = vpop.xlane.xlu2 %1338 }
 0x325   : > { %v1345_v19 = vsel %vm1341_vm15, %v1339_v18, 0.0 }
 0x326   : > { %v1347_v21 = vadd.f32 %v1345_v19, %v1316_v17 }
 0x327   : > { %1378 = vmax.xlane.f32.xlu2 %v1375_v22 }
 0x328   : > { %vm1365_vm0 = vcmp.lt.f32.partialorder %v1347_v21, 4.0 }
 0x329   : > { %v1367_v26 = vsel %vm1365_vm0, %v1355_v14, %v1343_v25 }
 0x33f   : > { %1418 = vperm.xlu2 %2124, %v1261_v9  }
 0x351   : > { %v1361_v27 = vpop.xlane.xlu2 %1360 }
 0x352   : > { %v1368_v31 = vsel %vm1364_vm11, %v1361_v27, 0.0 }
 0x353   : > { %v1370_v32 = vadd.f32 %v1368_v31, %v1346_v1 }
 0x355   : > { %vm1380_vm1 = vcmp.lt.f32.partialorder %v1370_v32, 4.0 }
 0x359   : > { %v1377_v30 = vpop.xlane.xlu2 %1376 }
 0x35a   : > { %v1382_v37 = vsel %vm1380_vm1, %v1377_v30, %v1366_v5 }
 0x35b   : > { %vm1390_vm2 = vcmp.lt.f32.partialorder %v2695_v29, %v1382_v37 }
 0x35c   : > { %v1392_v45 = vsel %vm1390_vm2, %v2743_v53, %v2695_v29 }
 0x35d   : > { %v1404_v56 = vmul.f32 %v1397_v48, %v1392_v45  ;;  %v1421_v20 = vmul.f32 %v1415_v10, %v1392_v45 }
 0x392   : > { %v1363_v33 = vpop.xlane.xlu2 %1362 }
 0x393   : > { %v1369_v35 = vsel %vm1365_vm0, %v1363_v33, 0.0 }
 0x394   : > { %v1371_v39 = vadd.f32 %v1369_v35, %v1347_v21 }
 0x396   : > { %vm1381_vm3 = vcmp.lt.f32.partialorder %v1371_v39, 4.0 }
 0x39a   : > { %v1379_v42 = vpop.xlane.xlu2 %1378 }
 0x39b   : > { %v1383_v47 = vsel %vm1381_vm3, %v1379_v42, %v1367_v26 }
 0x39c   : > { %vm1391_vm4 = vcmp.lt.f32.partialorder %v2702_v40, %v1383_v47 }
 0x39d   : > { %v1393_v52 = vsel %vm1391_vm4, %v2745_v2, %v2702_v40  ;;  %v1436_v40 = vld [vmem:[%s2684_s10 + $0x2] sm:$0x1] }
 0x39e   : > { %v1405_v57 = vmul.f32 %v1402_v51, %v1393_v52 }
 0x3a0   : > { %v1406_v58 = vmax.f32 %v1404_v56, %v1405_v57 }
 0x3a2   : > { %v1407_v12 = vrot.slane %v1406_v58, 4  ;;  %v1419_v16 = vpop.permute.xlu2 %1418 }
 0x3a3   : > { %v1422_v24 = vmul.f32 %v1419_v16, %v1393_v52 }
 0x3a4   : > { %v1408_v28 = vmax.f32 %v1406_v58, %v1407_v12 }
 0x3a5   : > { %v1423_v29 = vmax.f32 %v1421_v20, %v1422_v24 }
 0x3a6   : > { %v1409_v59 = vrot.slane %v1408_v28, 2 }
 0x3a7   : > { %v1424_v8 = vrot.slane %v1423_v29, 4 }
 0x3a8   : > { %v1410_v36 = vmax.f32 %v1408_v28, %v1409_v59 }
 0x3a9   : > { %v1425_v44 = vmax.f32 %v1423_v29, %v1424_v8 }
 0x3aa   : > { %v1411_v53 = vrot.slane %v1410_v36, 1 }
 0x3ab   : > { %v1426_v2 = vrot.slane %v1425_v44, 2 }
 0x3ac   : > { %v1412_v62 = vmax.f32 %v1410_v36, %v1411_v53 }
 0x3ad   : > { %v1427_v13 = vmax.f32 %v1425_v44, %v1426_v2 }
 0x3ae   : > { %v1437_v34 = vmax.f32 %v1436_v40, %v1412_v62 }
 0x3af   : > { %v1428_v38 = vrot.slane %v1427_v13, 1 }
 0x3b0   : > { %1438 = vst [vmem:[%s2684_s10 + $0x2] sm:$0x1] %v1437_v34 }
 0x3b1   : > { %v1429_v54 = vmax.f32 %v1427_v13, %v1428_v38 }
 0x3b3   : > { %v1440_v0 = vmax.f32 %v1439_v43, %v1429_v54 }
 0x3b5   : > { %1441 = vst [vmem:[%s2684_s10 + $0x3] sm:$0x1] %v1440_v0 }
 0x3b6   : > { %2153 = shalt.err (!%p2150_p5)
}
 0x3b7   : > { %2041 = dma.vmem_to_hbm [thread:$0]  (%p2284_p4), %s1456_s17, 64, %s1458_s24, %s1443_s21  }
 0x3b8 PF: > { %p2047_p6 = scmp.ge.s32.totalorder %s2204_s23, 2  ;;  %s1469_s8 = sand.u32 1, %s2184_s18  }
 0x3b9   : > { %s1470_s10 = scalar_lea.sflag [#allocation4], %s1469_s8 }
 0x3ba   : > { %p2044_p7 = pnand %p2047_p6, %p2291_p8 }
 0x3bc   : > { %p2045_p9 = pneg %p2044_p7 }
 0x3be   : > { %2179 = dma.done.wait (%p2045_p9), %s1470_s10, 64  }
 0x3bf   : > { %2181 = vsyncadd (%p2045_p9), %s1470_s10, 4294967232  ;;  %s18_s23 = sadd.s32 1, %s2204_s23   ;;  %s2822_s18 = smov %s2188_s19 }
 0x3c0   : > { %p15_p10 = scmp.ge.s32.totalorder %s18_s23, 4   ;;  %s2823_s19 = smov %s2192_s20 }
 0x3c1   : > { %s2824_s20 = smov %s2297_s6  ;;  %s2825_s21 = smov %s2200_s22 }
 0x3c2   : > { %s2826_s22 = smov %s2828_s26  ;;  %17 = sbr.rel (!%p15_p10) target bundleno = 4 (0x4), region = 91 }
 0x3c7   :  { %1476 = vsyncpa [#allocation4], 1 }
 0x3c8   :  { %1478 = vsyncpa [#allocation4 + $0x1], 1 }

</bundles_post_ra>
